<compile_context>
chip_gen: v5e
topology: v5e:2x2
jax: 0.10.0
libtpu: 0.0.40
codegen_flags: <defaults>
</compile_context>

<pallas_src>
import functools

import jax
import jax.numpy as jnp
from jax.experimental import pallas as pl
from jax.experimental.pallas import tpu as pltpu

EPS = 0.01


def _round_up(n, mult):
    return ((n + mult - 1) // mult) * mult


def _gram_kernel(x_ref, o_ref, acc_ref, *, scalar, p):
    """Streams (tm, p) tiles of X; accumulates the (p, p) Gram; epilogue adds I."""
    k = pl.program_id(0)

    @pl.when(k == 0)
    def _():
        acc_ref[...] = jnp.zeros_like(acc_ref)

    x = x_ref[...]                                  # (tm, p), input dtype (bf16/f32)
    # X_tile^T @ X_tile — contract the sample axis (axis 0 of both operands);
    # MXU consumes the transposed operand natively, accumulate in f32.
    acc_ref[...] += jax.lax.dot_general(
        x, x,
        dimension_numbers=(((0,), (0,)), ((), ())),
        preferred_element_type=jnp.float32,
    )

    @pl.when(k == pl.num_programs(0) - 1)
    def _():
        eye = (jax.lax.broadcasted_iota(jnp.int32, (p, p), 0)
               == jax.lax.broadcasted_iota(jnp.int32, (p, p), 1)
               ).astype(jnp.float32)
        o_ref[...] = eye + jnp.float32(scalar) * acc_ref[...]


def total_coding_rate(x, eps=EPS, tm=512):
    """x: (m, p) float array. Returns scalar -0.5 * logdet(I + p/(m*eps) * X^T X)."""
    m, p = x.shape
    scalar = float(p) / (float(m) * eps)            # uses the *unpadded* m

    itemsize = jnp.dtype(x.dtype).itemsize
    row_mult = 8 if itemsize >= 4 else 16           # sublane packing granularity

    # Shrink tm if the two double-buffered X tiles alone would blow VMEM (huge p).
    while tm > row_mult and 2 * tm * p * itemsize > 16 * 1024 * 1024:
        tm //= 2
    tm = max(_round_up(tm, row_mult), row_mult)

    # Final tile sizing + zero-pad the sample axis (exact: zero rows leave X^T X unchanged).
    tm_eff = _round_up(m, row_mult) if m <= tm else tm
    m_pad = _round_up(m, tm_eff)
    if m_pad != m:
        x = jnp.pad(x, ((0, m_pad - m), (0, 0)))
    grid = (m_pad // tm_eff,)

    # Explicit VMEM budget: 2 input buffers + accumulator + (double-buffered) output.
    vmem_bytes = 2 * tm_eff * p * itemsize + 3 * p * p * 4 + (1 << 20)
    vmem_bytes = min(max(vmem_bytes, 8 * 1024 * 1024), 48 * 1024 * 1024)

    kernel = functools.partial(_gram_kernel, scalar=scalar, p=p)

    mat = pl.pallas_call(
        kernel,
        out_shape=jax.ShapeDtypeStruct((p, p), jnp.float32),
        grid_spec=pltpu.PrefetchScalarGridSpec(
            num_scalar_prefetch=0,
            grid=grid,
            in_specs=[pl.BlockSpec((tm_eff, p), lambda k: (k, 0))],
            out_specs=pl.BlockSpec((p, p), lambda k: (0, 0)),
            scratch_shapes=[pltpu.VMEM((p, p), jnp.float32)],
        ),
        compiler_params=pltpu.CompilerParams(
            dimension_semantics=("arbitrary",),     # m is the reduction axis
            vmem_limit_bytes=vmem_bytes,
        ),
    )(x)

    # TODO(synk): logdet (Cholesky) has no clean Pallas TPU equivalent; the p x p
    # SPD matrix is tiny, so slogdet runs in plain JAX. Sign is always +1 because
    # I + scalar * X^T X is SPD for eps > 0, so the sign can be safely dropped.
    _, logabsdet = jnp.linalg.slogdet(mat)
    return -0.5 * logabsdet


def total_coding_rate_ref(x, eps=EPS):
    """Pure-JAX reference mirroring the PyTorch module exactly."""
    m, p = x.shape
    w = x.T                                         # (p, m)
    scalar = p / (m * eps)
    mat = jnp.eye(p, dtype=jnp.float32) + scalar * (w.astype(jnp.float32)
                                                    @ w.T.astype(jnp.float32))
    return -0.5 * jnp.linalg.slogdet(mat)[1]


if __name__ == "__main__":
    key = jax.random.PRNGKey(0)

    # Case 1: small single-tile problem (batch=16, feature dim=128).
    m1, p1 = 16, 128
    x1 = jax.random.normal(key, (m1, p1), dtype=jnp.float32)
    out1 = jax.block_until_ready(jax.jit(total_coding_rate)(x1))
    ref1 = total_coding_rate_ref(x1)
    assert jnp.allclose(out1, ref1, rtol=1e-4, atol=1e-4), (out1, ref1)

    # Case 2: ragged, multi-tile m to exercise the grid accumulation + padding.
    m2, p2 = 528, 128
    x2 = jax.random.normal(jax.random.PRNGKey(1), (m2, p2), dtype=jnp.float32)
    out2 = jax.block_until_ready(jax.jit(total_coding_rate)(x2))
    ref2 = total_coding_rate_ref(x2)
    assert jnp.allclose(out2, ref2, rtol=1e-4, atol=1e-4), (out2, ref2)

    print("KERNEL_OK")
</pallas_src>

<mosaic_0001>
module attributes {stable_mosaic.version = 11 : i64} {
  func.func @_gram_kernel(%arg0: i32, %arg1: memref<16x128xf32, #tpu.memory_space<vmem>>, %arg2: memref<128x128xf32, #tpu.memory_space<vmem>>, %arg3: memref<128x128xf32, #tpu.memory_space<vmem>>) attributes {dimension_semantics = [#tpu.dimension_semantics<arbitrary>], iteration_bounds = array<i64: 1>, scalar_prefetch = 0 : i64, scratch_operands = 1 : i64, tpu.core_type = #tpu.core_type<tc>, window_params = [{transform_indices = @transform_0, window_bounds = array<i64: 16, 128>}, {pipeline_mode = #tpu.pipeline_mode<synchronous>, transform_indices = @transform_1, window_bounds = array<i64: 128, 128>}]} {
    %c0_i32 = arith.constant 0 : i32
    %0 = arith.cmpi eq, %arg0, %c0_i32 : i32
    %1 = arith.extui %0 : i1 to i32
    %c0_i32_0 = arith.constant 0 : i32
    %2 = arith.cmpi ne, %1, %c0_i32_0 : i32
    scf.if %2 {
      %cst_8 = arith.constant 0.000000e+00 : f32
      %11 = vector.broadcast %cst_8 : f32 to vector<128x128xf32>
      %c0_9 = arith.constant 0 : index
      %c0_10 = arith.constant 0 : index
      %12 = vector.load %arg3[%c0_9, %c0_10] : memref<128x128xf32, #tpu.memory_space<vmem>>, vector<128x128xf32>
      tpu.vector_store %arg3[%c0_9, %c0_10], %11 {strides = array<i32>} : memref<128x128xf32, #tpu.memory_space<vmem>>, vector<128x128xf32>,
    } else {
    }
    %c0 = arith.constant 0 : index
    %c0_1 = arith.constant 0 : index
    %3 = vector.load %arg1[%c0, %c0_1] : memref<16x128xf32, #tpu.memory_space<vmem>>, vector<16x128xf32>
    %c0_2 = arith.constant 0 : index
    %c0_3 = arith.constant 0 : index
    %4 = vector.load %arg3[%c0_2, %c0_3] : memref<128x128xf32, #tpu.memory_space<vmem>>, vector<128x128xf32>
    %cst = arith.constant dense<0.000000e+00> : vector<128x128xf32>
    %5 = tpu.matmul %3, %3, %cst {dimension_numbers = #tpu.dot_dimension_numbers<[0], [0], [1], [1], [0, 1, 1, 1], [], []>} : vector<16x128xf32>, vector<16x128xf32>, vector<128x128xf32> -> vector<128x128xf32>
    %6 = arith.addf %4, %5 : vector<128x128xf32>
    %c0_4 = arith.constant 0 : index
    %c0_5 = arith.constant 0 : index
    %7 = vector.load %arg3[%c0_4, %c0_5] : memref<128x128xf32, #tpu.memory_space<vmem>>, vector<128x128xf32>
    tpu.vector_store %arg3[%c0_4, %c0_5], %6 {strides = array<i32>} : memref<128x128xf32, #tpu.memory_space<vmem>>, vector<128x128xf32>,
    %c0_i32_6 = arith.constant 0 : i32
    %8 = arith.cmpi eq, %arg0, %c0_i32_6 : i32
    %9 = arith.extui %8 : i1 to i32
    %c0_i32_7 = arith.constant 0 : i32
    %10 = arith.cmpi ne, %9, %c0_i32_7 : i32
    scf.if %10 {
      %11 = tpu.iota {dimensions = array<i32: 0>} : vector<128x128xi32>
      %12 = tpu.iota {dimensions = array<i32: 1>} : vector<128x128xi32>
      %13 = arith.cmpi eq, %11, %12 : vector<128x128xi32>
      %14 = arith.extui %13 : vector<128x128xi1> to vector<128x128xi32>
      %15 = arith.sitofp %14 : vector<128x128xi32> to vector<128x128xf32>
      %c0_8 = arith.constant 0 : index
      %c0_9 = arith.constant 0 : index
      %16 = vector.load %arg3[%c0_8, %c0_9] : memref<128x128xf32, #tpu.memory_space<vmem>>, vector<128x128xf32>
      %cst_10 = arith.constant 8.000000e+02 : f32
      %17 = vector.broadcast %cst_10 : f32 to vector<128x128xf32>
      %18 = arith.mulf %17, %16 : vector<128x128xf32>
      %19 = arith.addf %15, %18 : vector<128x128xf32>
      %c0_11 = arith.constant 0 : index
      %c0_12 = arith.constant 0 : index
      %20 = vector.load %arg2[%c0_11, %c0_12] : memref<128x128xf32, #tpu.memory_space<vmem>>, vector<128x128xf32>
      tpu.vector_store %arg2[%c0_11, %c0_12], %19 {strides = array<i32>} : memref<128x128xf32, #tpu.memory_space<vmem>>, vector<128x128xf32>,
    } else {
    }
    return
  }
  func.func @transform_0(%arg0: i32) -> (i32, i32) {
    %c0_i32 = arith.constant 0 : i32
    %c0_i32_0 = arith.constant 0 : i32
    return %arg0, %c0_i32 : i32, i32
  }
  func.func @transform_1(%arg0: i32) -> (i32, i32) {
    %c0_i32 = arith.constant 0 : i32
    %c0_i32_0 = arith.constant 0 : i32
    %c0_i32_1 = arith.constant 0 : i32
    return %c0_i32, %c0_i32_0 : i32, i32
  }
}

</mosaic_0001>

<bundles_post_ra>
// kernel: custom-call.2
= control target key start
LH: loop header
LB: loop body
LE: loop exit
PB: predicated region body
PF: predicated region fallthrough
CT: control target
= control target key end

     0   :  { %5 = vsyncpa [#allocation4], 0  ;;  %s2187_s0 = inlined_call_operand.vmem [shape: f32[128,128], index: 0, kind: input, shape index: {}]   ;;  %s2188_s1 = inlined_call_operand.vmem [shape: f32[128,128], index: 1, kind: output, shape index: {0}]   ;;  %s2189_s2 = inlined_call_operand.hbm [shape: s32[128], index: 2, kind: output, shape index: {1}]   ;;  %s2190_s3 = inlined_call_operand.hbm [shape: s32[128], index: 3, kind: output, shape index: {2}]  }
   0x1   :  { %6 = vsyncpa [#allocation7], 0  ;;  %s1455_s14 = scalar_lea.vmem %s2187_s0, 120  ;;  %v17_v0 = vld [vmem:[%s2187_s0] sm:$0xff]   ;;  %s1384_s18 = smov [#allocation0]  }
   0x2   :  { %s1087_s17 = sadd.s32 4294967232, %s1455_s14  ;;  %v1380_v1 = vmov %v17_v0   ;;  %s1388_s21 = smov %s2187_s0  }
   0x3 LB: > { %25 = vst [vmem:[%s1386_s18] sm:$0xff] %v1382_v1  ;;  %v26_v2 = vld [vmem:[%s1390_s21 + $0x8] sm:$0xff]  ;;  %v28_v3 = vld [vmem:[%s1390_s21 + $0x10] sm:$0xff]  ;;  %v30_v4 = vld [vmem:[%s1390_s21 + $0x18] sm:$0xff]  ;;  %s40_s0 = scalar_lea.vmem %s1390_s21, 64   ;;  %s41_s22 = scalar_lea.vmem %s1386_s18, 64   ;;  %s1390_s21 = sphi %s1388_s21, %s1389_s21   ;;  %s1386_s18 = sphi %s1384_s18, %s1385_s18   ;;  %v1382_v1 = vphi %v1380_v1, %v42_v1  }
   0x4   : > { %27 = vst [vmem:[%s1386_s18 + $0x8] sm:$0xff] %v26_v2  ;;  %v32_v5 = vld [vmem:[%s1390_s21 + $0x20] sm:$0xff]  ;;  %v34_v6 = vld [vmem:[%s1390_s21 + $0x28] sm:$0xff]  ;;  %v36_v7 = vld [vmem:[%s1390_s21 + $0x30] sm:$0xff]  ;;  %p22_p0 = scmp.gt.s32.totalorder %s40_s0, %s1087_s17 }
   0x5   : > { %29 = vst [vmem:[%s1386_s18 + $0x10] sm:$0xff] %v28_v3  ;;  %v38_v8 = vld [vmem:[%s1390_s21 + $0x38] sm:$0xff]  ;;  %v42_v1 = vld [vmem:[%s1390_s21 + $0x40] sm:$0xff]   ;;  %s1389_s21 = smov %s40_s0   ;;  %p1051_p1 = scmp.gt.s32.totalorder (%p22_p0), %s40_s0, %s1455_s14 }
   0x6   : > { %31 = vst [vmem:[%s1386_s18 + $0x18] sm:$0xff] %v30_v4  ;;  %24 = sbr.rel (!%p22_p0) target bundleno = 3 (0x3), region = 179 }
   0x7   : > { %33 = vst [vmem:[%s1386_s18 + $0x20] sm:$0xff] %v32_v5 }
   0x8   : > { %35 = vst [vmem:[%s1386_s18 + $0x28] sm:$0xff] %v34_v6 }
   0x9   : > { %37 = vst [vmem:[%s1386_s18 + $0x30] sm:$0xff] %v36_v7 }
   0xa   : > { %39 = vst [vmem:[%s1386_s18 + $0x38] sm:$0xff] %v38_v8  ;;  %s1385_s18 = smov %s41_s22  }
   0xb   :  { %1052 = sbr.rel (%p1051_p1) target bundleno = 24 (0x18), region = 184  ;;  %s1392_s23 = smov (!%p1051_p1), %s41_s22  }
   0xc   :  { %s1396_s24 = smov (!%p1051_p1), %s40_s0  }
  0x10 LB: > { %v50_v9 = vld [vmem:[%s1398_s24] sm:$0xff]  ;;  %s52_s24 = scalar_lea.vmem %s1398_s24, 8   ;;  %s1398_s24 = sphi %s1396_s24, %s52_s24   ;;  %s1394_s23 = sphi %s1392_s23, %s53_s23  }
  0x11   : > { %51 = vst [vmem:[%s1394_s23] sm:$0xff] %v50_v9  ;;  %s53_s23 = scalar_lea.vmem %s1394_s23, 8   ;;  %p47_p2 = scmp.gt.s32.totalorder %s52_s24, %s1455_s14 }
  0x13   :  { %49 = sbr.rel (!%p47_p2) target bundleno = 16 (0x10), region = 190 }
  0x18 PF:  { %v126_v13 = vlaneseq  ;;  %v1428_v28 = vmov 0   ;;  %s1400_s25 = smov 0  }
  0x19   :  { %v63_v10 = vld [vmem:[#allocation0] sm:$0xff]  ;;  %v67_v11 = vld [vmem:[#allocation0 + $0x8] sm:$0xff]  ;;  %v71_v12 = vld [vmem:[#allocation0 + $0x10] sm:$0xff]  ;;  %125 = vst [vmem:[#allocation2] sm:$0x1] %v1428_v28 }
  0x1a   :  { %64 = vst [vmem:[#allocation1] sm:$0xff] %v63_v10  ;;  %v75_v14 = vld [vmem:[#allocation0 + $0x18] sm:$0xff]  ;;  %v79_v15 = vld [vmem:[#allocation0 + $0x20] sm:$0xff]  ;;  %v1469_v16 = vshrl.u32 %v126_v13, 7  ;;  %v83_v17 = vld [vmem:[#allocation0 + $0x28] sm:$0xff] }
  0x1b   :  { %68 = vst [vmem:[#allocation1 + $0x8] sm:$0xff] %v67_v11  ;;  %v87_v18 = vld [vmem:[#allocation0 + $0x30] sm:$0xff]  ;;  %v91_v19 = vld [vmem:[#allocation0 + $0x38] sm:$0xff]  ;;  %v95_v20 = vld [vmem:[#allocation0 + $0x40] sm:$0xff] }
  0x1c   :  { %72 = vst [vmem:[#allocation1 + $0x10] sm:$0xff] %v71_v12  ;;  %v99_v21 = vld [vmem:[#allocation0 + $0x48] sm:$0xff]  ;;  %v103_v22 = vld [vmem:[#allocation0 + $0x50] sm:$0xff]  ;;  %v107_v23 = vld [vmem:[#allocation0 + $0x58] sm:$0xff] }
  0x1d   :  { %76 = vst [vmem:[#allocation1 + $0x18] sm:$0xff] %v75_v14  ;;  %v111_v24 = vld [vmem:[#allocation0 + $0x60] sm:$0xff]  ;;  %v115_v25 = vld [vmem:[#allocation0 + $0x68] sm:$0xff]  ;;  %v119_v26 = vld [vmem:[#allocation0 + $0x70] sm:$0xff] }
  0x1e   :  { %80 = vst [vmem:[#allocation1 + $0x20] sm:$0xff] %v79_v15  ;;  %v123_v27 = vld [vmem:[#allocation0 + $0x78] sm:$0xff] }
  0x1f   :  { %84 = vst [vmem:[#allocation1 + $0x28] sm:$0xff] %v83_v17 }
  0x20   :  { %88 = vst [vmem:[#allocation1 + $0x30] sm:$0xff] %v87_v18 }
  0x21   :  { %92 = vst [vmem:[#allocation1 + $0x38] sm:$0xff] %v91_v19 }
  0x22   :  { %96 = vst [vmem:[#allocation1 + $0x40] sm:$0xff] %v95_v20 }
  0x23   :  { %100 = vst [vmem:[#allocation1 + $0x48] sm:$0xff] %v99_v21 }
  0x24   :  { %104 = vst [vmem:[#allocation1 + $0x50] sm:$0xff] %v103_v22 }
  0x25   :  { %108 = vst [vmem:[#allocation1 + $0x58] sm:$0xff] %v107_v23 }
  0x26   :  { %112 = vst [vmem:[#allocation1 + $0x60] sm:$0xff] %v111_v24 }
  0x27   :  { %116 = vst [vmem:[#allocation1 + $0x68] sm:$0xff] %v115_v25 }
  0x28   :  { %120 = vst [vmem:[#allocation1 + $0x70] sm:$0xff] %v119_v26 }
  0x29   :  { %124 = vst [vmem:[#allocation1 + $0x78] sm:$0xff] %v123_v27 }
  0x2a LB: > { %s1089_s26 = sshll.u32 %s1402_s25, 3  ;;  %s134_s25 = sadd.s32 1, %s1402_s25   ;;  %s1402_s25 = sphi %s1400_s25, %s134_s25  }
  0x2b   : > { %v138_v29 = vstv %s1089_s26  ;;  %s136_s27 = scalar_lea.vmem [#allocation8], %s1089_s26  ;;  %p131_p3 = scmp.ge.s32.totalorder %s134_s25, 16  }
  0x2c   : > { %v139_v30 = vadd.s32 %v138_v29, %v1469_v16  ;;  %s1472_s28 = smov (%p131_p3), 0  }
  0x2d   :  { %133 = sbr.rel (!%p131_p3) target bundleno = 42 (0x2a), region = 201 }
  0x2e   : > { %140 = vst [vmem:[%s136_s27] sm:$0xff] %v139_v30 }
  0x32 LB: > { %v151_v31 = vld [vmem:[#allocation1] sm:$0xff]  ;;  %v163_v32 = vld [vmem:[#allocation1 + $0x8] sm:$0xff]  ;;  %v1478_v33 = vadd.s32 8, %v1469_v16  ;;  %v1481_v35 = vstv %s1406_s28  ;;  %v175_v37 = vld [vmem:[#allocation1 + $0x10] sm:$0xff]  ;;  %v1486_v38 = vadd.s32 16, %v1469_v16  ;;  %v1493_v43 = vadd.s32 24, %v1469_v16  ;;  %s1406_s28 = sphi %s1472_s28, %s146_s28  }
  0x33   : > { %v152_v34 = vand.u32 2147483647, %v151_v31  ;;  %v164_v36 = vand.u32 2147483647, %v163_v32  ;;  %vm155_vm0 = vcmp.ge.s32.totalorder %v1469_v16, %v1481_v35  ;;  %v176_v41 = vand.u32 2147483647, %v175_v37 }
  0x34   : > { %vm167_vm3 = vcmp.ge.s32.totalorder %v1478_v33, %v1481_v35  ;;  %v187_v42 = vld [vmem:[#allocation1 + $0x18] sm:$0xff]  ;;  %vm179_vm6 = vcmp.ge.s32.totalorder %v1486_v38, %v1481_v35  ;;  %v199_v47 = vld [vmem:[#allocation1 + $0x20] sm:$0xff]  ;;  %v1499_v48 = vadd.s32 32, %v1469_v16  ;;  %vm191_vm9 = vcmp.ge.s32.totalorder %v1493_v43, %v1481_v35  ;;  %v211_v52 = vld [vmem:[#allocation1 + $0x28] sm:$0xff]  ;;  %s377_s29 = ssub.s32 128, %s1406_s28  ;;  %s395_s4 = scalar_lea.vmem [#allocation8], %s1406_s28 }
  0x35   : > { %vm1091_vm1 = vcmp.gt.f32.partialorder %v152_v34, -inf  ;;  %v188_v46 = vand.u32 2147483647, %v187_v42  ;;  %v200_v51 = vand.u32 2147483647, %v199_v47  ;;  %v1505_v53 = vadd.s32 40, %v1469_v16 }
  0x36   : > { %vm159_vm2 = vmand %vm155_vm0, %vm1091_vm1  ;;  %vm203_vm12 = vcmp.ge.s32.totalorder %v1499_v48, %v1481_v35  ;;  %v212_v56 = vand.u32 2147483647, %v211_v52  ;;  %v223_v57 = vld [vmem:[#allocation1 + $0x30] sm:$0xff]  ;;  %v1511_v58 = vadd.s32 48, %v1469_v16  ;;  %v235_v62 = vld [vmem:[#allocation1 + $0x38] sm:$0xff]  ;;  %v1517_v63 = vadd.s32 56, %v1469_v16 }
  0x37   : > { %v160_v39 = vsel %vm159_vm2, %v1469_v16, %v1481_v35  ;;  %v161_v40 = vsel %vm159_vm2, %v152_v34, -inf  ;;  %vm215_vm15 = vcmp.ge.s32.totalorder %v1505_v53, %v1481_v35  ;;  %v224_v61 = vand.u32 2147483647, %v223_v57  ;;  %v247_v3 = vld [vmem:[#allocation1 + $0x40] sm:$0xff]  ;;  %v259_v8 = vld [vmem:[#allocation1 + $0x48] sm:$0xff]  ;;  %v271_v14 = vld [vmem:[#allocation1 + $0x50] sm:$0xff] }
  0x38   : > { %vm170_vm4 = vcmp.lt.f32.partialorder %v161_v40, %v164_v36  ;;  %vm227_vm2 = vcmp.ge.s32.totalorder %v1511_v58, %v1481_v35  ;;  %v236_v2 = vand.u32 2147483647, %v235_v62  ;;  %v1523_v4 = vadd.s32 64, %v1469_v16  ;;  %v283_v20 = vld [vmem:[#allocation1 + $0x58] sm:$0xff]  ;;  %v295_v25 = vld [vmem:[#allocation1 + $0x60] sm:$0xff]  ;;  %v307_v30 = vld [vmem:[#allocation1 + $0x68] sm:$0xff] }
  0x39   : > { %vm171_vm5 = vmand %vm167_vm3, %vm170_vm4  ;;  %v248_v7 = vand.u32 2147483647, %v247_v3  ;;  %v1529_v9 = vadd.s32 72, %v1469_v16  ;;  %v260_v12 = vand.u32 2147483647, %v259_v8  ;;  %v1535_v15 = vadd.s32 80, %v1469_v16 }
  0x3a   : > { %v172_v44 = vsel %vm171_vm5, %v1478_v33, %v160_v39  ;;  %v173_v45 = vsel %vm171_vm5, %v164_v36, %v161_v40  ;;  %vm239_vm5 = vcmp.ge.s32.totalorder %v1517_v63, %v1481_v35  ;;  %v272_v19 = vand.u32 2147483647, %v271_v14  ;;  %v319_v37 = vld [vmem:[#allocation1 + $0x70] sm:$0xff]  ;;  %s389_s7 = scalar_lea.vmem [#allocation1], %s1406_s28  ;;  %s146_s28 = sadd.s32 1, %s1406_s28  }
  0x3b   : > { %vm182_vm7 = vcmp.lt.f32.partialorder %v173_v45, %v176_v41  ;;  %v1541_v21 = vadd.s32 88, %v1469_v16  ;;  %v284_v24 = vand.u32 2147483647, %v283_v20  ;;  %v1547_v26 = vadd.s32 96, %v1469_v16  ;;  %p143_p4 = scmp.ge.s32.totalorder %s146_s28, 128  }
  0x3c   : > { %vm183_vm8 = vmand %vm179_vm6, %vm182_vm7  ;;  %v296_v29 = vand.u32 2147483647, %v295_v25  ;;  %v1553_v31 = vadd.s32 104, %v1469_v16  ;;  %v308_v36 = vand.u32 2147483647, %v307_v30  ;;  %v1559_v39 = vadd.s32 112, %v1469_v16  ;;  %s1412_s12 = smov (%p143_p4), %s2188_s1  }
  0x3d   : > { %v184_v49 = vsel %vm183_vm8, %v1486_v38, %v172_v44  ;;  %v185_v50 = vsel %vm183_vm8, %v176_v41, %v173_v45  ;;  %vm251_vm8 = vcmp.ge.s32.totalorder %v1523_v4, %v1481_v35  ;;  %v320_v42 = vand.u32 2147483647, %v319_v37  ;;  %v331_v44 = vld [vmem:[#allocation1 + $0x78] sm:$0xff]  ;;  %v386_v30 = vld [vmem:[#allocation2] ss:$0 sm:$0xff]  ;;  %s1429_s8 = smov (%p143_p4), [#allocation1 + $0x78]  }
  0x3e   : > { %vm194_vm10 = vcmp.lt.f32.partialorder %v185_v50, %v188_v46  ;;  %v1565_v45 = vadd.s32 120, %v1469_v16  ;;  %s2175_s9 = sadd.s32 (%p143_p4), 4294967232, %s1429_s8  ;;  %s1416_s13 = smov (%p143_p4), [#allocation1]  }
  0x3f   : > { %vm195_vm11 = vmand %vm191_vm9, %vm194_vm10 }
  0x40   : > { %v196_v54 = vsel %vm195_vm11, %v1493_v43, %v184_v49  ;;  %v197_v55 = vsel %vm195_vm11, %v188_v46, %v185_v50  ;;  %vm263_vm11 = vcmp.ge.s32.totalorder %v1529_v9, %v1481_v35  ;;  %v332_v49 = vand.u32 2147483647, %v331_v44 }
  0x41   : > { %vm206_vm13 = vcmp.lt.f32.partialorder %v197_v55, %v200_v51 }
  0x42   : > { %vm207_vm14 = vmand %vm203_vm12, %vm206_vm13 }
  0x43   : > { %v208_v59 = vsel %vm207_vm14, %v1499_v48, %v196_v54  ;;  %v209_v60 = vsel %vm207_vm14, %v200_v51, %v197_v55  ;;  %vm275_vm14 = vcmp.ge.s32.totalorder %v1535_v15, %v1481_v35 }
  0x44   : > { %vm218_vm0 = vcmp.lt.f32.partialorder %v209_v60, %v212_v56 }
  0x45   : > { %vm219_vm1 = vmand %vm215_vm15, %vm218_vm0 }
  0x46   : > { %v220_v0 = vsel %vm219_vm1, %v1505_v53, %v208_v59  ;;  %v221_v1 = vsel %vm219_vm1, %v212_v56, %v209_v60  ;;  %vm287_vm1 = vcmp.ge.s32.totalorder %v1541_v21, %v1481_v35 }
  0x47   : > { %vm230_vm3 = vcmp.lt.f32.partialorder %v221_v1, %v224_v61 }
  0x48   : > { %vm231_vm4 = vmand %vm227_vm2, %vm230_vm3 }
  0x49   : > { %v232_v5 = vsel %vm231_vm4, %v1511_v58, %v220_v0  ;;  %v233_v6 = vsel %vm231_vm4, %v224_v61, %v221_v1  ;;  %vm299_vm4 = vcmp.ge.s32.totalorder %v1547_v26, %v1481_v35 }
  0x4a   : > { %vm242_vm6 = vcmp.lt.f32.partialorder %v233_v6, %v236_v2 }
  0x4b   : > { %vm243_vm7 = vmand %vm239_vm5, %vm242_vm6 }
  0x4c   : > { %v244_v10 = vsel %vm243_vm7, %v1517_v63, %v232_v5  ;;  %v245_v11 = vsel %vm243_vm7, %v236_v2, %v233_v6  ;;  %vm311_vm7 = vcmp.ge.s32.totalorder %v1553_v31, %v1481_v35 }
  0x4d   : > { %vm254_vm9 = vcmp.lt.f32.partialorder %v245_v11, %v248_v7 }
  0x4e   : > { %vm255_vm10 = vmand %vm251_vm8, %vm254_vm9 }
  0x4f   : > { %v256_v17 = vsel %vm255_vm10, %v1523_v4, %v244_v10  ;;  %v257_v18 = vsel %vm255_vm10, %v248_v7, %v245_v11  ;;  %vm323_vm10 = vcmp.ge.s32.totalorder %v1559_v39, %v1481_v35 }
  0x50   : > { %vm266_vm12 = vcmp.lt.f32.partialorder %v257_v18, %v260_v12 }
  0x51   : > { %vm267_vm13 = vmand %vm263_vm11, %vm266_vm12 }
  0x52   : > { %v268_v22 = vsel %vm267_vm13, %v1529_v9, %v256_v17  ;;  %v269_v23 = vsel %vm267_vm13, %v260_v12, %v257_v18  ;;  %vm335_vm13 = vcmp.ge.s32.totalorder %v1565_v45, %v1481_v35 }
  0x53   : > { %vm278_vm15 = vcmp.lt.f32.partialorder %v269_v23, %v272_v19 }
  0x54   : > { %vm279_vm0 = vmand %vm275_vm14, %vm278_vm15 }
  0x55   : > { %v280_v27 = vsel %vm279_vm0, %v1535_v15, %v268_v22  ;;  %v281_v28 = vsel %vm279_vm0, %v272_v19, %v269_v23 }
  0x56   : > { %vm290_vm2 = vcmp.lt.f32.partialorder %v281_v28, %v284_v24 }
  0x57   : > { %vm291_vm3 = vmand %vm287_vm1, %vm290_vm2 }
  0x58   : > { %v292_v32 = vsel %vm291_vm3, %v1541_v21, %v280_v27  ;;  %v293_v34 = vsel %vm291_vm3, %v284_v24, %v281_v28  ;;  %v1576_v28 = vand.u32 127, %v126_v13 }
  0x59   : > { %vm302_vm5 = vcmp.lt.f32.partialorder %v293_v34, %v296_v29 }
  0x5a   : > { %vm303_vm6 = vmand %vm299_vm4, %vm302_vm5 }
  0x5b   : > { %v304_v40 = vsel %vm303_vm6, %v1547_v26, %v292_v32  ;;  %v305_v41 = vsel %vm303_vm6, %v296_v29, %v293_v34  ;;  %v397_v34 = vld [vmem:[%s395_s4] ss:$0 sm:$0xff] }
  0x5c   : > { %vm314_vm8 = vcmp.lt.f32.partialorder %v305_v41, %v308_v36 }
  0x5d   : > { %vm315_vm9 = vmand %vm311_vm7, %vm314_vm8  ;;  %vm1580_vm7 = vcmp.eq.s32.totalorder %v1576_v28, %v1481_v35 }
  0x5e   : > { %v316_v46 = vsel %vm315_vm9, %v1553_v31, %v304_v40  ;;  %v317_v47 = vsel %vm315_vm9, %v308_v36, %v305_v41  ;;  %v391_v41 = vld [vmem:[%s389_s7] ss:$0 sm:$0xff]  ;;  %vm499_vm9 = vcmp.gt.s32.totalorder %v1493_v43, %v1481_v35 }
  0x5f   : > { %vm326_vm11 = vcmp.lt.f32.partialorder %v317_v47, %v320_v42 }
  0x60   : > { %vm327_vm12 = vmand %vm323_vm10, %vm326_vm11  ;;  %vm443_vm10 = vcmp.gt.s32.totalorder %v1478_v33, %v1481_v35  ;;  %vm2194_vm11 = vcmp.gt.s32.totalorder %v1469_v16, %v1481_v35 }
  0x61   : > { %v328_v50 = vsel %vm327_vm12, %v1559_v39, %v316_v46  ;;  %v329_v51 = vsel %vm327_vm12, %v320_v42, %v317_v47 }
  0x62   : > { %vm338_vm14 = vcmp.lt.f32.partialorder %v329_v51, %v332_v49 }
  0x63   : > { %vm339_vm15 = vmand %vm335_vm13, %vm338_vm14  ;;  %vm2193_vm13 = vcmp.gt.s32.totalorder %v1499_v48, %v1481_v35  ;;  %vm2192_vm14 = vcmp.gt.s32.totalorder %v1486_v38, %v1481_v35 }
  0x64   : > { %v340_v52 = vsel %vm339_vm15, %v1565_v45, %v328_v50  ;;  %v341_v54 = vsel %vm339_vm15, %v332_v49, %v329_v51  ;;  %vm2191_vm15 = vcmp.gt.s32.totalorder %v1565_v45, %v1481_v35 }
  0x65   : > { %v342_v55 = vrot.slane %v341_v54, 1  ;;  %v343_v56 = vrot.slane %v340_v52, 1 }
  0x67   : > { %vm344_vm0 = vcmp.ge.f32.partialorder %v342_v55, %v341_v54  ;;  %v347_v57 = vrot.slane %v342_v55, 1  ;;  %v348_v59 = vrot.slane %v343_v56, 1 }
  0x68   : > { %v345_v60 = vsel %vm344_vm0, %v342_v55, %v341_v54  ;;  %v346_v61 = vsel %vm344_vm0, %v343_v56, %v340_v52 }
  0x69   : > { %vm349_vm1 = vcmp.ge.f32.partialorder %v347_v57, %v345_v60  ;;  %v352_v62 = vrot.slane %v347_v57, 1  ;;  %v353_v0 = vrot.slane %v348_v59, 1 }
  0x6a   : > { %v350_v1 = vsel %vm349_vm1, %v347_v57, %v345_v60  ;;  %v351_v2 = vsel %vm349_vm1, %v348_v59, %v346_v61 }
  0x6b   : > { %vm354_vm2 = vcmp.ge.f32.partialorder %v352_v62, %v350_v1  ;;  %v357_v3 = vrot.slane %v352_v62, 1  ;;  %v358_v5 = vrot.slane %v353_v0, 1 }
  0x6c   : > { %v355_v6 = vsel %vm354_vm2, %v352_v62, %v350_v1  ;;  %v356_v7 = vsel %vm354_vm2, %v353_v0, %v351_v2  ;;  %vm2195_vm2 = vcmp.gt.s32.totalorder %v1511_v58, %v1481_v35 }
  0x6d   : > { %vm359_vm3 = vcmp.ge.f32.partialorder %v357_v3, %v355_v6  ;;  %v362_v8 = vrot.slane %v357_v3, 1  ;;  %v363_v10 = vrot.slane %v358_v5, 1 }
  0x6e   : > { %v360_v11 = vsel %vm359_vm3, %v357_v3, %v355_v6  ;;  %v361_v12 = vsel %vm359_vm3, %v358_v5, %v356_v7 }
  0x6f   : > { %vm364_vm4 = vcmp.ge.f32.partialorder %v362_v8, %v360_v11  ;;  %v367_v14 = vrot.slane %v362_v8, 1  ;;  %v368_v17 = vrot.slane %v363_v10, 1 }
  0x70   : > { %v365_v18 = vsel %vm364_vm4, %v362_v8, %v360_v11  ;;  %v366_v19 = vsel %vm364_vm4, %v363_v10, %v361_v12  ;;  %vm1727_vm4 = vmand %vm443_vm10, %vm1580_vm7 }
  0x71   : > { %vm369_vm5 = vcmp.ge.f32.partialorder %v367_v14, %v365_v18  ;;  %v372_v20 = vrot.slane %v367_v14, 1  ;;  %v373_v22 = vrot.slane %v368_v17, 1 }
  0x72   : > { %v370_v23 = vsel %vm369_vm5, %v367_v14, %v365_v18  ;;  %v371_v24 = vsel %vm369_vm5, %v368_v17, %v366_v19 }
  0x73   : > { %vm374_vm6 = vcmp.ge.f32.partialorder %v372_v20, %v370_v23 }
  0x74   : > { %v376_v25 = vsel %vm374_vm6, %v373_v22, %v371_v24 }
  0x75   : > { %378 = vrot.lane.b32.xlu0 %v376_v25, %s377_s29 }
  0xe7   : > { %v379_v27 = vpop.permute.xlu0 %378 }
  0xe8   : > { %1096 = vpush %v379_v27 }
 0x119   : > { %s1097_s30 = spop %1096 }
 0x11a   : > { %v385_v32 = vstv %s1097_s30  ;;  %s390_s5 = scalar_lea.vmem [#allocation1], %s1097_s30  ;;  %s396_s6 = scalar_lea.vmem [#allocation8], %s1097_s30 }
 0x11b   : > { %v387_v36 = vsel %vm1580_vm7, %v385_v32, %v386_v30  ;;  %v1587_v37 = vld [vmem:[%s390_s5] ss:$0 sm:$0xff] }
 0x11c   : > { %v398_v40 = vld [vmem:[%s396_s6] ss:$0 sm:$0xff]  ;;  %388 = vst [vmem:[#allocation2] sm:$0x1] %v387_v36  ;;  %vm401_vm8 = vcmp.ne.f32.partialorder %v1587_v37, 0.0 }
 0x11d   : > { %399 = vst [vmem:[%s396_s6] sm:$0x1] %v397_v34  ;;  %vm402_vm12 = vmand %vm1580_vm7, %vm401_vm8 }
 0x11e   : > { %400 = vst [vmem:[%s395_s4] sm:$0x1] %v398_v40  ;;  %v1600_v42 = vsel %vm402_vm12, %v1587_v37, 1.0 }
 0x11f   : > { %393 = vst [vmem:[%s390_s5] sm:$0x1] %v391_v41  ;;  %v1608_v44 = vsel %vm499_vm9, %v1600_v42, 1.0  ;;  %v1614_v46 = vsel %vm443_vm10, %v1600_v42, 1.0  ;;  %v1620_v47 = vsel %vm2194_vm11, %v1600_v42, 1.0  ;;  %v1629_v49 = vsel %vm2193_vm13, %v1600_v42, 1.0  ;;  %vm1706_vm13 = vmand %vm499_vm9, %vm1580_vm7 }
 0x120   : > { %394 = vst [vmem:[%s389_s7] sm:$0x1] %v1587_v37  ;;  %1230 = vrcp.f32 %v1608_v44  ;;  %v510_v50 = vand.u32 2147483647, %v1608_v44  ;;  %v512_v51 = vand.u32 2147483648, %v1608_v44  ;;  %v454_v52 = vand.u32 2147483647, %v1614_v46 }
 0x121   : > { %1232 = vrcp.f32 %v1614_v46  ;;  %v456_v54 = vand.u32 2147483648, %v1614_v46  ;;  %v426_v55 = vand.u32 2147483647, %v1620_v47  ;;  %v428_v56 = vand.u32 2147483648, %v1620_v47 }
 0x122   : > { %1234 = vrcp.f32 %v1620_v47  ;;  %v540_v57 = vand.u32 2147483648, %v1629_v49  ;;  %v1648_v59 = vsel %vm2192_vm14, %v1600_v42, 1.0  ;;  %v1654_v60 = vsel %vm2191_vm15, %v1600_v42, 1.0 }
 0x123   : > { %1236 = vrcp.f32 %v1629_v49  ;;  %vm506_vm0 = vweird.f32 %v1608_v44  ;;  %vm450_vm1 = vweird.f32 %v1614_v46  ;;  %vm1664_vm3 = vcmp.eq.f32.partialorder %v510_v50, 8.507059e+37 }
 0x124   : > { %1238 = vrcp.f32 %v1648_v59  ;;  %v513_v2 = vor.u32 1.1754944e-38, %v512_v51  ;;  %v538_v3 = vand.u32 2147483647, %v1629_v49  ;;  %vm1674_vm5 = vcmp.eq.f32.partialorder %v454_v52, 8.507059e+37 }
 0x125   : > { %v457_v8 = vor.u32 1.1754944e-38, %v456_v54  ;;  %1240 = vrcp.f32 %v1654_v60  ;;  %vm1681_vm6 = vcmp.eq.f32.partialorder %v426_v55, 8.507059e+37  ;;  %v429_v14 = vor.u32 1.1754944e-38, %v428_v56  ;;  %v879_v13 = vld [vmem:[#allocation8 + $0x50] sm:$0xff] (%p143_p4) }
 0x126   : > { %v1231_v61 = vpop.eup %1230  ;;  %v1686_v17 = vor.u32 1.1754944e-38, %v540_v57  ;;  %v482_v20 = vand.u32 2147483647, %v1648_v59  ;;  %v484_v22 = vand.u32 2147483648, %v1648_v59  ;;  %vm1695_vm14 = vcmp.eq.f32.partialorder %v538_v3, 8.507059e+37 }
 0x127   : > { %v1661_v62 = vpop.eup %1232  ;;  %v502_v0 = vmul.f32 %v1231_v61, %v1608_v44  ;;  %vm507_vm12 = vweird.f32 %v1231_v61  ;;  %v846_v36 = vand.u32 2147483647, %v1654_v60  ;;  %v1718_v40 = vsel %vm2195_vm2, %v1600_v42, 1.0 }
 0x128   : > { %v1670_v5 = vpop.eup %1234  ;;  %v446_v6 = vmul.f32 %v1661_v62, %v1614_v46  ;;  %vm451_vm15 = vweird.f32 %v1661_v62  ;;  %vm508_vm2 = vmor %vm506_vm0, %vm507_vm12  ;;  %vm1741_vm10 = vcmp.eq.f32.partialorder %v482_v20, 8.507059e+37  ;;  %v848_v56 = vand.u32 2147483648, %v1654_v60 }
 0x129   : > { %v503_v10 = vsub.f32 1.0, %v502_v0  ;;  %v418_v11 = vmul.f32 %v1670_v5, %v1620_v47  ;;  %v1688_v18 = vpop.eup %1236  ;;  %vm423_vm8 = vweird.f32 %v1670_v5  ;;  %1242 = vrcp.f32 %v1718_v40  ;;  %vm452_vm0 = vmor %vm450_vm1, %vm451_vm15 }
 0x12a   : > { %v447_v19 = vsub.f32 1.0, %v446_v6  ;;  %v530_v25 = vmul.f32 %v1688_v18, %v1629_v49  ;;  %v1699_v30 = vpop.eup %1238  ;;  %vm535_vm9 = vweird.f32 %v1688_v18  ;;  %vm639_vm12 = vcmp.gt.s32.totalorder %v1523_v4, %v1481_v35  ;;  %v496_v6 = vld [vmem:[#allocation1 + $0x18] sm:$0xff] }
 0x12b   : > { %v504_v23 = vmul.f32 %v1231_v61, %v503_v10  ;;  %v419_v24 = vsub.f32 1.0, %v418_v11  ;;  %v474_v52 = vmul.f32 %v1699_v30, %v1648_v59  ;;  %v1734_v54 = vpop.eup %1240  ;;  %vm479_vm15 = vweird.f32 %v1699_v30 }
 0x12c   : > { %v448_v34 = vmul.f32 %v1661_v62, %v447_v19  ;;  %v531_v51 = vsub.f32 1.0, %v530_v25  ;;  %v838_v46 = vmul.f32 %v1734_v54, %v1654_v60  ;;  %v440_v19 = vld [vmem:[#allocation1 + $0x8] sm:$0xff]  ;;  %vm2214_vm1 = vcmp.gt.s32.totalorder %v1469_v16, %v1481_v35 }
 0x12d   : > { %v505_v43 = vadd.f32 %v1231_v61, %v504_v23  ;;  %v420_v50 = vmul.f32 %v1670_v5, %v419_v24  ;;  %v475_v3 = vsub.f32 1.0, %v474_v52  ;;  %v412_v23 = vld [vmem:[#allocation1] sm:$0xff]  ;;  %v485_v41 = vor.u32 1.1754944e-38, %v484_v22  ;;  %v881_v16 = vld [vmem:[#allocation8 + $0x58] sm:$0xff] (%p143_p4) }
 0x12e   : > { %v449_v55 = vadd.f32 %v1661_v62, %v448_v34  ;;  %v532_v0 = vmul.f32 %v1688_v18, %v531_v51 }
 0x12f   : > { %v509_v57 = vsel %vm508_vm2, %v1231_v61, %v505_v43  ;;  %v421_v44 = vadd.f32 %v1670_v5, %v420_v50  ;;  %vm2213_vm2 = vweird.f32 %v1620_v47  ;;  %v1243_v12 = vpop.eup %1242  ;;  %v524_v50 = vld [vmem:[#allocation1 + $0x20] sm:$0xff] }
 0x130   : > { %v514_v10 = vsel %vm1664_vm3, %v513_v2, %v509_v57  ;;  %v453_v11 = vsel %vm452_vm0, %v1661_v62, %v449_v55  ;;  %vm424_vm11 = vmor %vm2213_vm2, %vm423_vm8  ;;  %v533_v62 = vadd.f32 %v1688_v18, %v532_v0  ;;  %vm843_vm8 = vweird.f32 %v1734_v54  ;;  %v468_v0 = vld [vmem:[#allocation1 + $0x10] sm:$0xff] }
 0x131   : > { %v1766_v61 = vmul.f32 %v514_v10, %v496_v6  ;;  %v458_v20 = vsel %vm1674_vm5, %v457_v8, %v453_v11  ;;  %v425_v1 = vsel %vm424_vm11, %v1670_v5, %v421_v44  ;;  %vm1776_vm3 = vmand %vm2214_vm1, %vm1580_vm7  ;;  %vm2217_vm11 = vweird.f32 %v1629_v49 }
 0x132   : > { %v1781_v2 = vmul.f32 %v458_v20, %v440_v19  ;;  %v430_v7 = vsel %vm1681_vm6, %v429_v14, %v425_v1  ;;  %vm536_vm5 = vmor %vm2217_vm11, %vm535_vm9  ;;  %v476_v5 = vmul.f32 %v1699_v30, %v475_v3  ;;  %v839_v8 = vsub.f32 1.0, %v838_v46 }
 0x133   : > { %v517_v24 = vsel %vm1706_vm13, %v1766_v61, 0.0  ;;  %v1793_v25 = vmul.f32 %v430_v7, %v412_v23  ;;  %v537_v34 = vsel %vm536_vm5, %v1688_v18, %v533_v62  ;;  %vm2218_vm13 = vweird.f32 %v1648_v59 }
 0x134   : > { %518 = vadd.xlane.f32.xlu2 %v517_v24  ;;  %v461_v49 = vsel %vm1727_vm4, %v1781_v2, 0.0  ;;  %v542_v14 = vsel %vm1695_vm14, %v1686_v17, %v537_v34  ;;  %v477_v43 = vadd.f32 %v1699_v30, %v476_v5  ;;  %v840_v32 = vmul.f32 %v1734_v54, %v839_v8  ;;  %vm480_vm6 = vmor %vm2218_vm13, %vm479_vm15  ;;  %v580_v24 = vld [vmem:[#allocation1 + $0x30] sm:$0xff] }
 0x135   : > { %462 = vadd.xlane.f32.xlu1 %v461_v49  ;;  %v433_v18 = vsel %vm1776_vm3, %v1793_v25, 0.0  ;;  %vm1814_vm4 = vcmp.eq.f32.partialorder %v846_v36, 8.507059e+37  ;;  %v586_v17 = vmul.f32 %v1243_v12, %v1718_v40  ;;  %v849_v55 = vor.u32 1.1754944e-38, %v848_v56 }
 0x136   : > { %434 = vadd.xlane.f32.xlu0 %v433_v18  ;;  %v481_v51 = vsel %vm480_vm6, %v1699_v30, %v477_v43  ;;  %v841_v52 = vadd.f32 %v1734_v54, %v840_v32  ;;  %v594_v57 = vand.u32 2147483647, %v1718_v40  ;;  %v1822_v44 = vmul.f32 %v542_v14, %v524_v50 }
 0x137   : > { %v486_v59 = vsel %vm1741_vm10, %v485_v41, %v481_v51  ;;  %vm2221_vm14 = vweird.f32 %v1654_v60  ;;  %v587_v22 = vsub.f32 1.0, %v586_v17  ;;  %vm2222_vm0 = vcmp.gt.s32.totalorder %v1505_v53, %v1481_v35 }
 0x138   : > { %vm844_vm9 = vmor %vm2221_vm14, %vm843_vm8  ;;  %v1834_v30 = vsel %vm2222_vm0, %v1600_v42, 1.0  ;;  %vm2223_vm2 = vcmp.gt.s32.totalorder %v1499_v48, %v1481_v35  ;;  %v1845_v33 = vmul.f32 %v486_v59, %v468_v0  ;;  %v596_v56 = vand.u32 2147483648, %v1718_v40  ;;  %v832_v48 = vld [vmem:[#allocation1 + $0x78] sm:$0xff] }
 0x139   : > { %vm1841_vm15 = vmand %vm2223_vm2, %vm1580_vm7  ;;  %v845_v60 = vsel %vm844_vm9, %v1734_v54, %v841_v52  ;;  %1244 = vrcp.f32 %v1834_v30  ;;  %vm2226_vm10 = vcmp.gt.s32.totalorder %v1486_v38, %v1481_v35  ;;  %v588_v10 = vmul.f32 %v1243_v12, %v587_v22 }
 0x13a   : > { %vm1855_vm1 = vmand %vm2226_vm10, %vm1580_vm7  ;;  %v850_v6 = vsel %vm1814_vm4, %v849_v55, %v845_v60  ;;  %vm591_vm3 = vweird.f32 %v1243_v12  ;;  %vm611_vm11 = vcmp.gt.s32.totalorder %v1517_v63, %v1481_v35  ;;  %vm2229_vm5 = vcmp.gt.s32.totalorder %v1565_v45, %v1481_v35 }
 0x13b   : > { %v1863_v54 = vmul.f32 %v850_v6, %v832_v48  ;;  %vm1870_vm8 = vmand %vm2229_vm5, %vm1580_vm7  ;;  %vm590_vm13 = vweird.f32 %v1718_v40  ;;  %v1879_v11 = vsel %vm639_vm12, %v1600_v42, 1.0  ;;  %vm695_vm6 = vcmp.gt.s32.totalorder %v1535_v15, %v1481_v35 }
 0x13c   : > { %v545_v46 = vsel %vm1841_vm15, %v1822_v44, 0.0  ;;  %v589_v45 = vadd.f32 %v1243_v12, %v588_v10  ;;  %vm1886_vm4 = vcmp.eq.f32.partialorder %v594_v57, 8.507059e+37  ;;  %1246 = vrcp.f32 %v1879_v11  ;;  %vm592_vm14 = vmor %vm590_vm13, %vm591_vm3 }
 0x13d   : > { %546 = vadd.xlane.f32.xlu2 %v545_v46  ;;  %v489_v40 = vsel %vm1855_vm1, %v1845_v33, 0.0  ;;  %v597_v20 = vor.u32 1.1754944e-38, %v596_v56  ;;  %v566_v1 = vand.u32 2147483647, %v1834_v30  ;;  %v568_v47 = vand.u32 2147483648, %v1834_v30 }
 0x13e   : > { %490 = vadd.xlane.f32.xlu1 %v489_v40  ;;  %v853_v62 = vsel %vm1870_vm8, %v1863_v54, 0.0  ;;  %v593_v23 = vsel %vm592_vm14, %v1243_v12, %v589_v45  ;;  %v1903_v7 = vsel %vm611_vm11, %v1600_v42, 1.0  ;;  %v1909_v5 = vsel %vm695_vm6, %v1600_v42, 1.0  ;;  %v552_v40 = vld [vmem:[#allocation1 + $0x28] sm:$0xff] }
 0x13f   : > { %v1245_v8 = vpop.eup %1244  ;;  %854 = vadd.xlane.f32.xlu0 %v853_v62  ;;  %v598_v34 = vsel %vm1886_vm4, %v597_v20, %v593_v23  ;;  %v650_v12 = vand.u32 2147483647, %v1879_v11  ;;  %v652_v49 = vand.u32 2147483648, %v1879_v11  ;;  %1248 = vrcp.f32 %v1903_v7 }
 0x140   : > { %v1916_v14 = vmul.f32 %v598_v34, %v580_v24  ;;  %v558_v43 = vmul.f32 %v1245_v8, %v1834_v30  ;;  %vm2234_vm9 = vcmp.gt.s32.totalorder %v1511_v58, %v1481_v35  ;;  %vm562_vm2 = vweird.f32 %v1834_v30 }
 0x141   : > { %vm1924_vm0 = vmand %vm2234_vm9, %vm1580_vm7  ;;  %1250 = vrcp.f32 %v1909_v5  ;;  %vm2196_vm15 = vcmp.gt.s32.totalorder %v1529_v9, %v1481_v35  ;;  %vm1932_vm10 = vcmp.eq.f32.partialorder %v566_v1, 8.507059e+37  ;;  %v569_v17 = vor.u32 1.1754944e-38, %v568_v47 }
 0x142   : > { %v1247_v18 = vpop.eup %1246  ;;  %v559_v41 = vsub.f32 1.0, %v558_v43  ;;  %vm646_vm1 = vweird.f32 %v1879_v11  ;;  %vm563_vm3 = vweird.f32 %v1245_v8  ;;  %vm1938_vm5 = vcmp.eq.f32.partialorder %v650_v12, 8.507059e+37 }
 0x143   : > { %v642_v58 = vmul.f32 %v1247_v18, %v1879_v11  ;;  %v653_v51 = vor.u32 1.1754944e-38, %v652_v49  ;;  %v601_v52 = vsel %vm1924_vm0, %v1916_v14, 0.0  ;;  %v622_v57 = vand.u32 2147483647, %v1903_v7  ;;  %vm564_vm4 = vmor %vm562_vm2, %vm563_vm3  ;;  %v636_v49 = vld [vmem:[#allocation1 + $0x40] sm:$0xff] }
 0x144   : > { %v560_v55 = vmul.f32 %v1245_v8, %v559_v41  ;;  %v1950_v0 = vsel %vm2196_vm15, %v1600_v42, 1.0  ;;  %vm618_vm8 = vweird.f32 %v1903_v7  ;;  %v624_v36 = vand.u32 2147483648, %v1903_v7 }
 0x145   : > { %v1249_v59 = vpop.eup %1248  ;;  %602 = vadd.xlane.f32.xlu2 %v601_v52  ;;  %v643_v22 = vsub.f32 1.0, %v642_v58  ;;  %1252 = vrcp.f32 %v1950_v0  ;;  %vm702_vm13 = vweird.f32 %v1909_v5  ;;  %v706_v3 = vand.u32 2147483647, %v1909_v5 }
 0x146   : > { %v561_v60 = vadd.f32 %v1245_v8, %v560_v55  ;;  %v614_v56 = vmul.f32 %v1249_v59, %v1903_v7  ;;  %vm647_vm14 = vweird.f32 %v1247_v18  ;;  %v708_v10 = vand.u32 2147483648, %v1909_v5  ;;  %v608_v55 = vld [vmem:[#allocation1 + $0x38] sm:$0xff] }
 0x147   : > { %v1251_v48 = vpop.eup %1250  ;;  %v644_v6 = vmul.f32 %v1247_v18, %v643_v22  ;;  %vm751_vm9 = vcmp.gt.s32.totalorder %v1547_v26, %v1481_v35  ;;  %vm1964_vm0 = vcmp.eq.f32.partialorder %v622_v57, 8.507059e+37  ;;  %vm2243_vm2 = vcmp.gt.s32.totalorder %v1505_v53, %v1481_v35 }
 0x148   : > { %v565_v38 = vsel %vm564_vm4, %v1245_v8, %v561_v60  ;;  %v615_v46 = vsub.f32 1.0, %v614_v56  ;;  %v698_v19 = vmul.f32 %v1251_v48, %v1909_v5  ;;  %vm1976_vm3 = vmand %vm2243_vm2, %vm1580_vm7  ;;  %vm619_vm4 = vweird.f32 %v1249_v59  ;;  %v692_v5 = vld [vmem:[#allocation1 + $0x50] sm:$0xff] }
 0x149   : > { %v570_v30 = vsel %vm1932_vm10, %v569_v17, %v565_v38  ;;  %v645_v1 = vadd.f32 %v1247_v18, %v644_v6  ;;  %v1984_v47 = vsel %vm751_vm9, %v1600_v42, 1.0  ;;  %vm648_vm10 = vmor %vm646_vm1, %vm647_vm14  ;;  %v625_v34 = vor.u32 1.1754944e-38, %v624_v36 }
 0x14a   : > { %v1986_v62 = vmul.f32 %v570_v30, %v552_v40  ;;  %v616_v23 = vmul.f32 %v1249_v59, %v615_v46  ;;  %v699_v8 = vsub.f32 1.0, %v698_v19  ;;  %1254 = vrcp.f32 %v1984_v47  ;;  %vm2003_vm1 = vmand %vm639_vm12, %vm1580_vm7 }
 0x14b   : > { %v1253_v53 = vpop.eup %1252  ;;  %v649_v24 = vsel %vm648_vm10, %v1247_v18, %v645_v1  ;;  %vm703_vm2 = vweird.f32 %v1251_v48  ;;  %vm723_vm15 = vcmp.gt.s32.totalorder %v1541_v21, %v1481_v35  ;;  %vm620_vm14 = vmor %vm618_vm8, %vm619_vm4  ;;  %v709_v27 = vor.u32 1.1754944e-38, %v708_v10 }
 0x14c   : > { %v573_v12 = vsel %vm1976_vm3, %v1986_v62, 0.0  ;;  %v654_v11 = vsel %vm1938_vm5, %v653_v51, %v649_v24  ;;  %v617_v32 = vadd.f32 %v1249_v59, %v616_v23  ;;  %v700_v18 = vmul.f32 %v1251_v48, %v699_v8  ;;  %vm704_vm12 = vmor %vm702_vm13, %vm703_vm2 }
 0x14d   : > { %574 = vadd.xlane.f32.xlu1 %v573_v12  ;;  %v2007_v41 = vmul.f32 %v654_v11, %v636_v49  ;;  %v670_v17 = vmul.f32 %v1253_v53, %v1950_v0  ;;  %v678_v58 = vand.u32 2147483647, %v1950_v0  ;;  %v680_v51 = vand.u32 2147483648, %v1950_v0  ;;  %v664_v49 = vld [vmem:[#allocation1 + $0x48] sm:$0xff] }
 0x14e   : > { %v621_v50 = vsel %vm620_vm14, %v1249_v59, %v617_v32  ;;  %v701_v4 = vadd.f32 %v1251_v48, %v700_v18  ;;  %v2019_v52 = vsel %vm723_vm15, %v1600_v42, 1.0  ;;  %vm707_vm5 = vcmp.eq.f32.partialorder %v706_v3, 8.507059e+37 }
 0x14f   : > { %v657_v7 = vsel %vm2003_vm1, %v2007_v41, 0.0  ;;  %v626_v57 = vsel %vm1964_vm0, %v625_v34, %v621_v50  ;;  %v671_v59 = vsub.f32 1.0, %v670_v17  ;;  %1256 = vrcp.f32 %v2019_v52  ;;  %vm2038_vm0 = vmand %vm611_vm11, %vm1580_vm7 }
 0x150   : > { %v1255_v22 = vpop.eup %1254  ;;  %658 = vadd.xlane.f32.xlu2 %v657_v7  ;;  %v2030_v36 = vmul.f32 %v626_v57, %v608_v55  ;;  %v705_v60 = vsel %vm704_vm12, %v1251_v48, %v701_v4  ;;  %vm674_vm8 = vweird.f32 %v1950_v0  ;;  %vm675_vm13 = vweird.f32 %v1253_v53  ;;  %vm2055_vm11 = vmand %vm695_vm6, %vm1580_vm7 }
 0x151   : > { %v710_v6 = vsel %vm707_vm5, %v709_v27, %v705_v60  ;;  %v672_v10 = vmul.f32 %v1253_v53, %v671_v59  ;;  %v754_v38 = vmul.f32 %v1255_v22, %v1984_v47  ;;  %vm2045_vm3 = vcmp.eq.f32.partialorder %v678_v58, 8.507059e+37  ;;  %vm676_vm2 = vmor %vm674_vm8, %vm675_vm13  ;;  %v748_v27 = vld [vmem:[#allocation1 + $0x60] sm:$0xff] }
 0x152   : > { %v2043_v46 = vmul.f32 %v710_v6, %v692_v5  ;;  %v681_v48 = vor.u32 1.1754944e-38, %v680_v51  ;;  %v762_v45 = vand.u32 2147483647, %v1984_v47  ;;  %vm807_vm4 = vcmp.gt.s32.totalorder %v1559_v39, %v1481_v35  ;;  %vm2113_vm13 = vmand %vm751_vm9, %vm1580_vm7  ;;  %v720_v6 = vld [vmem:[#allocation1 + $0x58] sm:$0xff] }
 0x153   : > { %v673_v19 = vadd.f32 %v1253_v53, %v672_v10  ;;  %v755_v40 = vsub.f32 1.0, %v754_v38  ;;  %vm779_vm10 = vcmp.gt.s32.totalorder %v1553_v31, %v1481_v35  ;;  %v629_v30 = vsel %vm2038_vm0, %v2030_v36, 0.0 }
 0x154   : > { %v764_v15 = vand.u32 2147483648, %v1984_v47  ;;  %v2073_v20 = vsel %vm807_vm4, %v1600_v42, 1.0  ;;  %v2079_v1 = vsel %vm779_vm10, %v1600_v42, 1.0  ;;  %vm759_vm6 = vweird.f32 %v1255_v22 }
 0x155   : > { %v1257_v23 = vpop.eup %1256  ;;  %630 = vadd.xlane.f32.xlu1 %v629_v30  ;;  %v677_v8 = vsel %vm676_vm2, %v1253_v53, %v673_v19  ;;  %v756_v24 = vmul.f32 %v1255_v22, %v755_v40  ;;  %1258 = vrcp.f32 %v2073_v20  ;;  %v713_v12 = vsel %vm2055_vm11, %v2043_v46, 0.0 }
 0x156   : > { %v682_v0 = vsel %vm2045_vm3, %v681_v48, %v677_v8  ;;  %v726_v34 = vmul.f32 %v1257_v23, %v2019_v52  ;;  %vm758_vm1 = vweird.f32 %v1984_v47  ;;  %1260 = vrcp.f32 %v2079_v1 }
 0x157   : > { %v757_v11 = vadd.f32 %v1255_v22, %v756_v24  ;;  %v2090_v42 = vmul.f32 %v682_v0, %v664_v49  ;;  %vm760_vm14 = vmor %vm758_vm1, %vm759_vm6  ;;  %v765_v53 = vor.u32 1.1754944e-38, %v764_v15  ;;  %vm2254_vm12 = vcmp.gt.s32.totalorder %v1529_v9, %v1481_v35  ;;  %v776_v49 = vld [vmem:[#allocation1 + $0x68] sm:$0xff] }
 0x158   : > { %714 = vadd.xlane.f32.xlu2 %v713_v12  ;;  %v727_v43 = vsub.f32 1.0, %v726_v34  ;;  %vm2097_vm5 = vmand %vm2254_vm12, %vm1580_vm7  ;;  %vm763_vm8 = vcmp.eq.f32.partialorder %v762_v45, 8.507059e+37  ;;  %v736_v47 = vand.u32 2147483648, %v2019_v52  ;;  %vm731_vm0 = vweird.f32 %v1257_v23 }
 0x159   : > { %v761_v18 = vsel %vm760_vm14, %v1255_v22, %v757_v11  ;;  %v734_v50 = vand.u32 2147483647, %v2019_v52  ;;  %v685_v9 = vsel %vm2097_vm5, %v2090_v42, 0.0  ;;  %vm730_vm3 = vweird.f32 %v2019_v52  ;;  %vm740_vm6 = vmand %vm723_vm15, %vm1580_vm7 }
 0x15a   : > { %v766_v17 = vsel %vm763_vm8, %v765_v53, %v761_v18  ;;  %v728_v58 = vmul.f32 %v1257_v23, %v727_v43  ;;  %vm732_vm11 = vmor %vm730_vm3, %vm731_vm0  ;;  %v737_v22 = vor.u32 1.1754944e-38, %v736_v47  ;;  %v818_v38 = vand.u32 2147483647, %v2073_v20 }
 0x15b   : > { %v1259_v4 = vpop.eup %1258  ;;  %v2103_v51 = vmul.f32 %v766_v17, %v748_v27  ;;  %vm735_vm2 = vcmp.eq.f32.partialorder %v734_v50, 8.507059e+37  ;;  %v820_v52 = vand.u32 2147483648, %v2073_v20  ;;  %vm814_vm1 = vweird.f32 %v2073_v20  ;;  %vm824_vm15 = vmand %vm807_vm4, %vm1580_vm7 }
 0x15c   : > { %v729_v55 = vadd.f32 %v1257_v23, %v728_v58  ;;  %v810_v57 = vmul.f32 %v1259_v4, %v2073_v20  ;;  %v1261_v59 = vpop.eup %1260  ;;  %vm815_vm9 = vweird.f32 %v1259_v4  ;;  %v792_v63 = vand.u32 2147483648, %v2079_v1  ;;  %v804_v20 = vld [vmem:[#allocation1 + $0x70] sm:$0xff]  ;;  %vm796_vm4 = vmand %vm779_vm10, %vm1580_vm7 }
 0x15d   : > { %686 = vadd.xlane.f32.xlu1 %v685_v9  ;;  %v782_v5 = vmul.f32 %v1261_v59, %v2079_v1  ;;  %v769_v26 = vsel %vm2113_vm13, %v2103_v51, 0.0  ;;  %vm787_vm14 = vweird.f32 %v1261_v59  ;;  %v790_v30 = vand.u32 2147483647, %v2079_v1  ;;  %vm816_vm12 = vmor %vm814_vm1, %vm815_vm9 }
 0x15e   : > { %v733_v60 = vsel %vm732_vm11, %v1257_v23, %v729_v55  ;;  %v811_v56 = vsub.f32 1.0, %v810_v57  ;;  %vm819_vm5 = vcmp.eq.f32.partialorder %v818_v38, 8.507059e+37  ;;  %v821_v15 = vor.u32 1.1754944e-38, %v820_v52 }
 0x15f   : > { %v738_v10 = vsel %vm735_vm2, %v737_v22, %v733_v60  ;;  %v783_v45 = vsub.f32 1.0, %v782_v5  ;;  %vm786_vm8 = vweird.f32 %v2079_v1  ;;  %v793_v0 = vor.u32 1.1754944e-38, %v792_v63 }
 0x160   : > { %770 = vadd.xlane.f32.xlu2 %v769_v26  ;;  %v2125_v3 = vmul.f32 %v738_v10, %v720_v6  ;;  %v812_v48 = vmul.f32 %v1259_v4, %v811_v56  ;;  %vm788_vm0 = vmor %vm786_vm8, %vm787_vm14  ;;  %vm791_vm13 = vcmp.eq.f32.partialorder %v790_v30, 8.507059e+37  ;;  %vm407_vm3 = vcmp.gt.s32.totalorder %v1576_v28, %v1481_v35 }
 0x161   : > { %v784_v40 = vmul.f32 %v1261_v59, %v783_v45  ;;  %v408_v1 = vsel %vm407_vm3, %v1587_v37, 0.0 }
 0x162   : > { %v813_v19 = vadd.f32 %v1259_v4, %v812_v48  ;;  %v741_v23 = vsel %vm740_vm6, %v2125_v3, 0.0 }
 0x163   : > { %v785_v21 = vadd.f32 %v1261_v59, %v784_v40 }
 0x164   : > { %v817_v8 = vsel %vm816_vm12, %v1259_v4, %v813_v19 }
 0x165   : > { %742 = vadd.xlane.f32.xlu1 %v741_v23  ;;  %v822_v24 = vsel %vm819_vm5, %v821_v15, %v817_v8  ;;  %v789_v12 = vsel %vm788_vm0, %v1261_v59, %v785_v21  ;;  %v863_v21 = vld [vmem:[#allocation8 + $0x10] sm:$0xff] (%p143_p4) }
 0x166   : > { %v2142_v34 = vmul.f32 %v822_v24, %v804_v20  ;;  %v794_v11 = vsel %vm791_vm13, %v793_v0, %v789_v12  ;;  %v865_v20 = vld [vmem:[#allocation8 + $0x18] sm:$0xff] (%p143_p4)  ;;  %v867_v24 = vld [vmem:[#allocation8 + $0x20] sm:$0xff] (%p143_p4)  ;;  %v869_v0 = vld [vmem:[#allocation8 + $0x28] sm:$0xff] (%p143_p4) }
 0x167   : > { %v2145_v43 = vmul.f32 %v794_v11, %v776_v49  ;;  %v873_v12 = vld [vmem:[#allocation8 + $0x38] sm:$0xff] (%p143_p4)  ;;  %v875_v49 = vld [vmem:[#allocation8 + $0x40] sm:$0xff] (%p143_p4)  ;;  %v877_v11 = vld [vmem:[#allocation8 + $0x48] sm:$0xff] (%p143_p4) }
 0x168   : > { %v825_v53 = vsel %vm824_vm15, %v2142_v34, 0.0 }
 0x169   : > { %826 = vadd.xlane.f32.xlu2 %v825_v53  ;;  %v797_v39 = vsel %vm796_vm4, %v2145_v43, 0.0  ;;  %v883_v53 = vld [vmem:[#allocation8 + $0x60] sm:$0xff] (%p143_p4) }
 0x16d   : > { %798 = vadd.xlane.f32.xlu1 %v797_v39  ;;  %v887_v39 = vld [vmem:[#allocation8 + $0x70] sm:$0xff] (%p143_p4) }
 0x1a7   : > { %v519_v32 = vpop.xlane.xlu2 %518 }
 0x1a8   : > { %v520_v18 = vmul.f32 %v519_v32, %v408_v1  ;;  %v463_v47 = vpop.xlane.xlu1 %462  ;;  %v925_v32 = vld [vmem:[#allocation2] sm:$0x1] (%p143_p4) }
 0x1a9   : > { %v464_v27 = vmul.f32 %v463_v47, %v408_v1  ;;  %v435_v17 = vpop.xlane.xlu0 %434  ;;  %928 = vst [vmem:[#allocation3] sm:$0x1] (%p143_p4), %v925_v32 }
 0x1aa   : > { %v521_v58 = vsub.f32 %v1766_v61, %v520_v18  ;;  %v436_v29 = vmul.f32 %v435_v17, %v408_v1 }
 0x1ab   : > { %v465_v50 = vsub.f32 %v1781_v2, %v464_v27 }
 0x1ac   : > { %522 = vst [vmem:[#allocation1 + $0x18] sm:$0xff] %v521_v58  ;;  %v437_v31 = vsub.f32 %v1793_v25, %v436_v29 }
 0x1ad   : > { %466 = vst [vmem:[#allocation1 + $0x8] sm:$0xff] %v465_v50 }
 0x1ae   : > { %438 = vst [vmem:[#allocation1] sm:$0xff] %v437_v31 }
 0x1b0   : > { %v547_v4 = vpop.xlane.xlu2 %546 }
 0x1b1   : > { %v548_v9 = vmul.f32 %v547_v4, %v408_v1  ;;  %v491_v35 = vpop.xlane.xlu1 %490 }
 0x1b2   : > { %v492_v28 = vmul.f32 %v491_v35, %v408_v1  ;;  %v855_v37 = vpop.xlane.xlu0 %854 }
 0x1b3   : > { %v549_v7 = vsub.f32 %v1822_v44, %v548_v9  ;;  %v856_v55 = vmul.f32 %v855_v37, %v408_v1 }
 0x1b4   : > { %v493_v57 = vsub.f32 %v1845_v33, %v492_v28 }
 0x1b5   : > { %550 = vst [vmem:[#allocation1 + $0x20] sm:$0xff] %v549_v7  ;;  %v857_v61 = vsub.f32 %v1863_v54, %v856_v55  ;;  %v945_v18 = vld [vmem:[#allocation1] sm:$0xff] (%p143_p4)  }
 0x1b6   : > { %494 = vst [vmem:[#allocation1 + $0x10] sm:$0xff] %v493_v57  ;;  %v1408_v17 = vmov (%p143_p4), %v945_v18  }
 0x1b7   : > { %858 = vst [vmem:[#allocation1 + $0x78] sm:$0xff] %v857_v61 }
 0x1b8   : > { %v603_v2 = vpop.xlane.xlu2 %602 }
 0x1b9   : > { %v604_v59 = vmul.f32 %v603_v2, %v408_v1 }
 0x1bb   : > { %v605_v25 = vsub.f32 %v1916_v14, %v604_v59 }
 0x1bd   : > { %606 = vst [vmem:[#allocation1 + $0x30] sm:$0xff] %v605_v25 }
 0x1c0   : > { %v575_v22 = vpop.xlane.xlu1 %574 }
 0x1c1   : > { %v576_v60 = vmul.f32 %v575_v22, %v408_v1 }
 0x1c3   : > { %v577_v56 = vsub.f32 %v1986_v62, %v576_v60  ;;  %v659_v5 = vpop.xlane.xlu2 %658 }
 0x1c4   : > { %v660_v26 = vmul.f32 %v659_v5, %v408_v1 }
 0x1c5   : > { %578 = vst [vmem:[#allocation1 + $0x28] sm:$0xff] %v577_v56 }
 0x1c6   : > { %v661_v44 = vsub.f32 %v2007_v41, %v660_v26 }
 0x1c8   : > { %662 = vst [vmem:[#allocation1 + $0x40] sm:$0xff] %v661_v44  ;;  %v631_v33 = vpop.xlane.xlu1 %630 }
 0x1c9   : > { %v632_v6 = vmul.f32 %v631_v33, %v408_v1 }
 0x1cb   : > { %v633_v54 = vsub.f32 %v2030_v36, %v632_v6  ;;  %v715_v10 = vpop.xlane.xlu2 %714 }
 0x1cc   : > { %v716_v38 = vmul.f32 %v715_v10, %v408_v1 }
 0x1cd   : > { %634 = vst [vmem:[#allocation1 + $0x38] sm:$0xff] %v633_v54 }
 0x1ce   : > { %v717_v14 = vsub.f32 %v2043_v46, %v716_v38 }
 0x1d0   : > { %718 = vst [vmem:[#allocation1 + $0x50] sm:$0xff] %v717_v14  ;;  %v687_v52 = vpop.xlane.xlu1 %686 }
 0x1d1   : > { %v688_v48 = vmul.f32 %v687_v52, %v408_v1 }
 0x1d3   : > { %v689_v62 = vsub.f32 %v2090_v42, %v688_v48  ;;  %v771_v45 = vpop.xlane.xlu2 %770 }
 0x1d4   : > { %v772_v63 = vmul.f32 %v771_v45, %v408_v1 }
 0x1d5   : > { %690 = vst [vmem:[#allocation1 + $0x48] sm:$0xff] %v689_v62 }
 0x1d6   : > { %v773_v41 = vsub.f32 %v2103_v51, %v772_v63  ;;  %v859_v51 = vld [vmem:[#allocation8] sm:$0xff] (%p143_p4) }
 0x1d7   :  { %890 = vxpose.xlu0.b32.start [1/16] (narrow) (%p143_p4), %v859_v51, 8 }
 0x1d8   : > { %774 = vst [vmem:[#allocation1 + $0x60] sm:$0xff] %v773_v41  ;;  %v743_v19 = vpop.xlane.xlu1 %742 }
 0x1d9   : > { %v744_v40 = vmul.f32 %v743_v19, %v408_v1 }
 0x1db   : > { %v745_v36 = vsub.f32 %v2125_v3, %v744_v40  ;;  %v861_v3 = vld [vmem:[#allocation8 + $0x8] sm:$0xff] (%p143_p4) }
 0x1dc   : > { %v827_v30 = vpop.xlane.xlu2 %826 }
 0x1dd   : > { %746 = vst [vmem:[#allocation1 + $0x58] sm:$0xff] %v745_v36  ;;  %v828_v15 = vmul.f32 %v827_v30, %v408_v1 }
 0x1df   : > { %v829_v46 = vsub.f32 %v2142_v34, %v828_v15  ;;  %891 = vxpose.xlu0.b32.cont [2/16] (narrow) (%p143_p4), %v861_v3, 8  ;;  %v871_v34 = vld [vmem:[#allocation8 + $0x30] sm:$0xff] (%p143_p4) }
 0x1e0   : > { %v799_v23 = vpop.xlane.xlu1 %798 }
 0x1e1   : > { %830 = vst [vmem:[#allocation1 + $0x70] sm:$0xff] %v829_v46  ;;  %v800_v8 = vmul.f32 %v799_v23, %v408_v1  ;;  %145 = sbr.rel (!%p143_p4) target bundleno = 50 (0x32), region = 212  ;;  %v889_v1 = vld [vmem:[#allocation8 + $0x78] sm:$0xff] (%p143_p4) }
 0x1e3   : > { %v801_v42 = vsub.f32 %v2145_v43, %v800_v8  ;;  %v885_v43 = vld [vmem:[#allocation8 + $0x68] sm:$0xff] (%p143_p4) }
 0x1e5   : > { %802 = vst [vmem:[#allocation1 + $0x68] sm:$0xff] %v801_v42 }
 0x1e7   :  { %892 = vxpose.xlu0.b32.cont [3/16] (narrow) %v863_v21, 8 }
 0x1ef   :  { %893 = vxpose.xlu0.b32.cont [4/16] (narrow) %v865_v20, 8 }
 0x1f7   :  { %894 = vxpose.xlu0.b32.cont [5/16] (narrow) %v867_v24, 8 }
 0x1ff   :  { %895 = vxpose.xlu0.b32.cont [6/16] (narrow) %v869_v0, 8 }
 0x207   :  { %896 = vxpose.xlu0.b32.cont [7/16] (narrow) %v871_v34, 8 }
 0x20f   :  { %897 = vxpose.xlu0.b32.cont [8/16] (narrow) %v873_v12, 8 }
 0x217   :  { %898 = vxpose.xlu0.b32.cont [9/16] (narrow) %v875_v49, 8 }
 0x21f   :  { %899 = vxpose.xlu0.b32.cont [10/16] (narrow) %v877_v11, 8 }
 0x227   :  { %900 = vxpose.xlu0.b32.cont [11/16] (narrow) %v879_v13, 8 }
 0x22f   :  { %901 = vxpose.xlu0.b32.cont [12/16] (narrow) %v881_v16, 8 }
 0x237   :  { %902 = vxpose.xlu0.b32.cont [13/16] (narrow) %v883_v53, 8 }
 0x23f   :  { %903 = vxpose.xlu0.b32.cont [14/16] (narrow) %v885_v43, 8 }
 0x247   :  { %904 = vxpose.xlu0.b32.cont [15/16] (narrow) %v887_v39, 8 }
 0x24f   :  { %905 = vxpose.xlu0.b32.end [16/16] (narrow) %v889_v1, 8 }
 0x27b   :  { %v906_v47 = vpop.trf.xlu0 }
 0x27c   :  { %922 = vst [vmem:[#allocation5] sm:$0x1] %v906_v47 }
 0x283   :  { %v931_v27 = vld [vmem:[#allocation5] sm:$0x1] }
 0x284   :  { %934 = vst [vmem:[#allocation6] sm:$0x1] %v931_v27 }
 0x285 LB: > { %953 = vst [vmem:[%s1414_s12] sm:$0xff] %v1410_v17  ;;  %v954_v58 = vld [vmem:[%s1418_s13 + $0x8] sm:$0xff]  ;;  %v956_v29 = vld [vmem:[%s1418_s13 + $0x10] sm:$0xff]  ;;  %v958_v50 = vld [vmem:[%s1418_s13 + $0x18] sm:$0xff]  ;;  %s968_s1 = scalar_lea.vmem %s1418_s13, 64   ;;  %s969_s14 = scalar_lea.vmem %s1414_s12, 64   ;;  %s1418_s13 = sphi %s1416_s13, %s1417_s13   ;;  %s1414_s12 = sphi %s1412_s12, %s1413_s12   ;;  %v1410_v17 = vphi %v1408_v17, %v970_v17  }
 0x286   : > { %955 = vst [vmem:[%s1414_s12 + $0x8] sm:$0xff] %v954_v58  ;;  %v960_v31 = vld [vmem:[%s1418_s13 + $0x20] sm:$0xff]  ;;  %v962_v4 = vld [vmem:[%s1418_s13 + $0x28] sm:$0xff]  ;;  %v964_v9 = vld [vmem:[%s1418_s13 + $0x30] sm:$0xff]  ;;  %p950_p5 = scmp.gt.s32.totalorder %s968_s1, %s2175_s9 }
 0x287   : > { %957 = vst [vmem:[%s1414_s12 + $0x10] sm:$0xff] %v956_v29  ;;  %v966_v35 = vld [vmem:[%s1418_s13 + $0x38] sm:$0xff]  ;;  %v970_v17 = vld [vmem:[%s1418_s13 + $0x40] sm:$0xff]   ;;  %s1417_s13 = smov %s968_s1   ;;  %p1081_p6 = scmp.gt.s32.totalorder (%p950_p5), %s968_s1, [#allocation1 + $0x78] }
 0x288   : > { %959 = vst [vmem:[%s1414_s12 + $0x18] sm:$0xff] %v958_v50  ;;  %952 = sbr.rel (!%p950_p5) target bundleno = 645 (0x285), region = 223 }
 0x289   : > { %961 = vst [vmem:[%s1414_s12 + $0x20] sm:$0xff] %v960_v31 }
 0x28a   : > { %963 = vst [vmem:[%s1414_s12 + $0x28] sm:$0xff] %v962_v4 }
 0x28b   : > { %965 = vst [vmem:[%s1414_s12 + $0x30] sm:$0xff] %v964_v9 }
 0x28c   : > { %967 = vst [vmem:[%s1414_s12 + $0x38] sm:$0xff] %v966_v35  ;;  %s1413_s12 = smov %s969_s14  }
 0x28d   :  { %1082 = sbr.rel (%p1081_p6) target bundleno = 666 (0x29a), region = 228  ;;  %s1420_s15 = smov (!%p1081_p6), %s969_s14  }
 0x28e   :  { %s1424_s16 = smov (!%p1081_p6), %s968_s1  }
 0x292 LB: > { %v978_v28 = vld [vmem:[%s1426_s16] sm:$0xff]  ;;  %s980_s16 = scalar_lea.vmem %s1426_s16, 8   ;;  %s1426_s16 = sphi %s1424_s16, %s980_s16   ;;  %s1422_s15 = sphi %s1420_s15, %s981_s15  }
 0x293   : > { %979 = vst [vmem:[%s1422_s15] sm:$0xff] %v978_v28  ;;  %s981_s15 = scalar_lea.vmem %s1422_s15, 8   ;;  %p975_p7 = scmp.gt.s32.totalorder %s980_s16, [#allocation1 + $0x78] }
 0x295   :  { %977 = sbr.rel (!%p975_p7) target bundleno = 658 (0x292), region = 234 }
 0x29a PF:  { %s998_s19 = sshll.u32 %s2189_s2, 4  ;;  %s1430_s20 = smov [#allocation3]   ;;  %s999_s19 = int_to_ptr.hbm [resolvable:$true] %s998_s19 }
 0x29b   :  { %s996_s21 = sshll.u32 %s1430_s20, 4  ;;  %s1431_s0 = smov [#allocation6]   ;;  %s997_s21 = int_to_ptr.vmem [resolvable:$true] %s996_s21 }
 0x29c   :  { %1001 = dma.vmem_to_hbm [thread:$0]  %s997_s21, 16, %s999_s19, [#allocation4]  }
 0x29d   :  { %s1007_s22 = sshll.u32 %s1431_s0, 4  ;;  %s1009_s25 = sshll.u32 %s2190_s3, 4  ;;  %s1008_s22 = int_to_ptr.vmem [resolvable:$true] %s1007_s22  ;;  %s1010_s25 = int_to_ptr.hbm [resolvable:$true] %s1009_s25 }
 0x29e   :  { %1012 = dma.vmem_to_hbm [thread:$0]  %s1008_s22, 16, %s1010_s25, [#allocation7]  }
 0x29f   :  { %1376 = dma.done.wait [#allocation4], 16  }
 0x2a0   :  { %1377 = vsyncadd [#allocation4], 4294967280 }
 0x2a1   :  { %1378 = dma.done.wait [#allocation7], 16  }
 0x2a2   :  { %1379 = vsyncadd [#allocation7], 4294967280 }
 0x2a3   :  { %1021 = vsyncpa [#allocation4], 1 }
 0x2a4   :  { %1022 = vsyncpa [#allocation7], 1 }

// kernel: total_coding_rate.1
= control target key start
LH: loop header
LB: loop body
LE: loop exit
PB: predicated region body
PF: predicated region fallthrough
CT: control target
= control target key end

     0   :  { %6 = vsyncpa [#allocation4], 0  ;;  %s447_s9 = smov [#allocation3]   ;;  %s448_s11 = smov 128   ;;  %s580_s0 = inlined_call_operand.hbm [shape: f32[16,128], index: 0, kind: input, shape index: {}]   ;;  %s581_s1 = inlined_call_operand.vmem [shape: f32[128,128], index: 1, kind: output, shape index: {}]  }
   0x1   :  { %s11_s8 = sshll.u32 %s580_s0, 4  ;;  %s13_s10 = sshll.u32 %s447_s9, 4  ;;  %s12_s8 = int_to_ptr.hbm [resolvable:$true] %s11_s8  ;;  %s14_s10 = int_to_ptr.vmem [resolvable:$true] %s13_s10 }
   0x2   :  { %s449_s12 = smov 8  }
   0x3   :  { %19 = dma.hbm_to_vmem [thread:$0]  %s12_s8, 256, %s14_s10, [#allocation4], %s448_s11, %s448_s11, %s449_s12  }
   0x4   :  { %445 = dma.done.wait [#allocation4], 256  }
   0x5   :  { %446 = vsyncadd [#allocation4], 4294967040  ;;  %v44_v0 = vld [vmem:[#allocation3] sm:$0xff]  ;;  %v45_v1 = vld [vmem:[#allocation3 + $0x8] sm:$0xff]  ;;  %vm94_vm0 = vcmask 130048   ;;  %v243_v17 = vlaneseq  ;;  %v450_v22 = vmov 0.0  }
   0x6   :  { %62 = vxpose.xlu0.b32.start [1/2] (short) %v44_v0, 128  ;;  %157 = vmatpush.msra.mxu0 %v45_v1 }
   0x7   :  { %411 = vmatpush.msra.mxu1 %v45_v1  ;;  %412 = vmatpush.msra.mxu2 %v45_v1  ;;  %v479_v18 = vshrl.u32 %v243_v17, 7  ;;  %v481_v19 = vand.u32 127, %v243_v17 }
   0x8   :  { %158 = vmatpush.msra.mxu0 %v44_v0  ;;  %413 = vmatpush.msra.mxu3 %v45_v1 }
   0x9   :  { %414 = vmatpush.msra.mxu1 %v44_v0  ;;  %415 = vmatpush.msra.mxu2 %v44_v0  ;;  %vm262_vm1 = vcmp.eq.s32.totalorder %v479_v18, %v481_v19  ;;  %v245_v25 = vadd.s32 8, %v479_v18  ;;  %v246_v30 = vadd.s32 16, %v479_v18  ;;  %v247_v35 = vadd.s32 24, %v479_v18 }
   0xa   :  { %416 = vmatpush.msra.mxu3 %v44_v0  ;;  %v395_v23 = vsel %vm262_vm1, 1.0, %v450_v22  ;;  %v248_v40 = vadd.s32 32, %v479_v18  ;;  %v249_v45 = vadd.s32 40, %v479_v18  ;;  %v250_v50 = vadd.s32 48, %v479_v18 }
   0xb   :  { %vm263_vm2 = vcmp.eq.s32.totalorder %v245_v25, %v481_v19  ;;  %vm264_vm3 = vcmp.eq.s32.totalorder %v246_v30, %v481_v19  ;;  %vm265_vm4 = vcmp.eq.s32.totalorder %v247_v35, %v481_v19  ;;  %v251_v55 = vadd.s32 56, %v479_v18 }
   0xc   :  { %v396_v28 = vsel %vm263_vm2, 1.0, %v450_v22  ;;  %v397_v33 = vsel %vm264_vm3, 1.0, %v450_v22  ;;  %v398_v38 = vsel %vm265_vm4, 1.0, %v450_v22  ;;  %vm266_vm5 = vcmp.eq.s32.totalorder %v248_v40, %v481_v19 }
   0xd   :  { %v399_v43 = vsel %vm266_vm5, 1.0, %v450_v22  ;;  %vm267_vm6 = vcmp.eq.s32.totalorder %v249_v45, %v481_v19  ;;  %vm268_vm7 = vcmp.eq.s32.totalorder %v250_v50, %v481_v19  ;;  %vm269_vm8 = vcmp.eq.s32.totalorder %v251_v55, %v481_v19 }
   0xe   :  { %63 = vxpose.xlu0.b32.end [2/2] (short) %v45_v1, 128  ;;  %v400_v48 = vsel %vm267_vm6, 1.0, %v450_v22  ;;  %v401_v53 = vsel %vm268_vm7, 1.0, %v450_v22  ;;  %v402_v58 = vsel %vm269_vm8, 1.0, %v450_v22  ;;  %v252_v61 = vadd.s32 64, %v479_v18 }
   0xf   :  { %v253_v1 = vadd.s32 72, %v479_v18 }
  0x10   :  { %vm270_vm9 = vcmp.eq.s32.totalorder %v252_v61, %v481_v19 }
  0x11   :  { %v403_v63 = vsel %vm270_vm9, 1.0, %v450_v22  ;;  %vm271_vm10 = vcmp.eq.s32.totalorder %v253_v1, %v481_v19 }
  0xaa   :  { %v78_v2 = vpop.trf.xlu0 }
  0xab   :  { %379 = vmatmul.msk.f32.vlgmr.msra.gmra.mxu0 %vm94_vm0, %v78_v2 }
  0xb2   :  { %v79_v3 = vpop.trf.xlu0 }
  0xb3   :  { %380 = vmatmul.msk.f32.gmra.mxu0 %vm94_vm0, %v79_v3 }
  0xba   :  { %v80_v4 = vpop.trf.xlu0 }
  0xbb   :  { %381 = vmatmul.msk.f32.gmra.mxu0 %vm94_vm0, %v80_v4  ;;  %v404_v4 = vsel %vm271_vm10, 1.0, %v450_v22 }
  0xc2   :  { %v81_v5 = vpop.trf.xlu0 }
  0xc3   :  { %382 = vmatmul.msk.f32.gmra.mxu0 %vm94_vm0, %v81_v5 }
  0xca   :  { %v82_v6 = vpop.trf.xlu0 }
  0xcb   :  { %383 = vmatmul.msk.f32.vlgmr.msra.gmra.mxu1 %vm94_vm0, %v82_v6  ;;  %v254_v6 = vadd.s32 80, %v479_v18 }
  0xcd   :  { %vm272_vm11 = vcmp.eq.s32.totalorder %v254_v6, %v481_v19 }
  0xd2   :  { %v83_v7 = vpop.trf.xlu0 }
  0xd3   :  { %384 = vmatmul.msk.f32.gmra.mxu1 %vm94_vm0, %v83_v7 }
  0xda   :  { %v84_v8 = vpop.trf.xlu0 }
  0xdb   :  { %385 = vmatmul.msk.f32.gmra.mxu1 %vm94_vm0, %v84_v8 }
  0xe2   :  { %v85_v9 = vpop.trf.xlu0 }
  0xe3   :  { %386 = vmatmul.msk.f32.gmra.mxu1 %vm94_vm0, %v85_v9  ;;  %v405_v9 = vsel %vm272_vm11, 1.0, %v450_v22 }
  0xea   :  { %v86_v10 = vpop.trf.xlu0 }
  0xeb   :  { %387 = vmatmul.msk.f32.vlgmr.msra.gmra.mxu2 %vm94_vm0, %v86_v10 }
  0xf2   :  { %v87_v11 = vpop.trf.xlu0 }
  0xf3   :  { %388 = vmatmul.msk.f32.gmra.mxu2 %vm94_vm0, %v87_v11  ;;  %v255_v11 = vadd.s32 88, %v479_v18 }
  0xf5   :  { %vm273_vm12 = vcmp.eq.s32.totalorder %v255_v11, %v481_v19 }
  0xfa   :  { %v88_v12 = vpop.trf.xlu0 }
  0xfb   :  { %389 = vmatmul.msk.f32.gmra.mxu2 %vm94_vm0, %v88_v12 }
 0x102   :  { %v89_v13 = vpop.trf.xlu0 }
 0x103   :  { %390 = vmatmul.msk.f32.gmra.mxu2 %vm94_vm0, %v89_v13 }
 0x10a   :  { %v90_v14 = vpop.trf.xlu0 }
 0x10b   :  { %391 = vmatmul.msk.f32.vlgmr.msra.gmra.mxu3 %vm94_vm0, %v90_v14  ;;  %v406_v14 = vsel %vm273_vm12, 1.0, %v450_v22 }
 0x112   :  { %v91_v15 = vpop.trf.xlu0 }
 0x113   :  { %392 = vmatmul.msk.f32.gmra.mxu3 %vm94_vm0, %v91_v15 }
 0x11a   :  { %v92_v16 = vpop.trf.xlu0 }
 0x11b   :  { %393 = vmatmul.msk.f32.gmra.mxu3 %vm94_vm0, %v92_v16  ;;  %v256_v16 = vadd.s32 96, %v479_v18 }
 0x11d   :  { %vm274_vm13 = vcmp.eq.s32.totalorder %v256_v16, %v481_v19 }
 0x122   :  { %v93_v20 = vpop.trf.xlu0 }
 0x123   :  { %394 = vmatmul.msk.f32.gmra.mxu3 %vm94_vm0, %v93_v20 }
 0x128   :  { %v160_v21 = vpop.f32.mrf.mxu0 }
 0x129   :  { %v326_v24 = vmul.f32 800.0, %v160_v21  ;;  %v407_v21 = vsel %vm274_vm13, 1.0, %v450_v22 }
 0x12b   :  { %v342_v26 = vadd.f32 %v395_v23, %v326_v24  ;;  %v257_v24 = vadd.s32 104, %v479_v18 }
 0x12d   :  { %358 = vst [vmem:[%s581_s1] sm:$0xff] %v342_v26  ;;  %vm275_vm14 = vcmp.eq.s32.totalorder %v257_v24, %v481_v19 }
 0x130   :  { %v163_v27 = vpop.f32.mrf.mxu0 }
 0x131   :  { %v327_v29 = vmul.f32 800.0, %v163_v27  ;;  %v408_v27 = vsel %vm275_vm14, 1.0, %v450_v22 }
 0x133   :  { %v343_v31 = vadd.f32 %v396_v28, %v327_v29  ;;  %v258_v29 = vadd.s32 112, %v479_v18 }
 0x135   :  { %359 = vst [vmem:[%s581_s1 + $0x8] sm:$0xff] %v343_v31  ;;  %vm276_vm15 = vcmp.eq.s32.totalorder %v258_v29, %v481_v19 }
 0x138   :  { %v166_v32 = vpop.f32.mrf.mxu0 }
 0x139   :  { %v328_v34 = vmul.f32 800.0, %v166_v32  ;;  %v409_v32 = vsel %vm276_vm15, 1.0, %v450_v22 }
 0x13b   :  { %v344_v36 = vadd.f32 %v397_v33, %v328_v34  ;;  %v259_v34 = vadd.s32 120, %v479_v18 }
 0x13d   :  { %360 = vst [vmem:[%s581_s1 + $0x10] sm:$0xff] %v344_v36  ;;  %vm277_vm0 = vcmp.eq.s32.totalorder %v259_v34, %v481_v19 }
 0x140   :  { %v169_v37 = vpop.f32.mrf.mxu0 }
 0x141   :  { %v329_v39 = vmul.f32 800.0, %v169_v37  ;;  %v410_v37 = vsel %vm277_vm0, 1.0, %v450_v22 }
 0x143   :  { %v345_v41 = vadd.f32 %v398_v38, %v329_v39 }
 0x145   :  { %361 = vst [vmem:[%s581_s1 + $0x18] sm:$0xff] %v345_v41 }
 0x148   :  { %v172_v42 = vpop.f32.mrf.mxu1 }
 0x149   :  { %v330_v44 = vmul.f32 800.0, %v172_v42 }
 0x14b   :  { %v346_v46 = vadd.f32 %v399_v43, %v330_v44 }
 0x14d   :  { %362 = vst [vmem:[%s581_s1 + $0x20] sm:$0xff] %v346_v46 }
 0x150   :  { %v175_v47 = vpop.f32.mrf.mxu1 }
 0x151   :  { %v331_v49 = vmul.f32 800.0, %v175_v47 }
 0x153   :  { %v347_v51 = vadd.f32 %v400_v48, %v331_v49 }
 0x155   :  { %363 = vst [vmem:[%s581_s1 + $0x28] sm:$0xff] %v347_v51 }
 0x158   :  { %v178_v52 = vpop.f32.mrf.mxu1 }
 0x159   :  { %v332_v54 = vmul.f32 800.0, %v178_v52 }
 0x15b   :  { %v348_v56 = vadd.f32 %v401_v53, %v332_v54 }
 0x15d   :  { %364 = vst [vmem:[%s581_s1 + $0x30] sm:$0xff] %v348_v56 }
 0x160   :  { %v181_v57 = vpop.f32.mrf.mxu1 }
 0x161   :  { %v333_v59 = vmul.f32 800.0, %v181_v57 }
 0x163   :  { %v349_v60 = vadd.f32 %v402_v58, %v333_v59 }
 0x165   :  { %365 = vst [vmem:[%s581_s1 + $0x38] sm:$0xff] %v349_v60 }
 0x16e   :  { %v184_v62 = vpop.f32.mrf.mxu2 }
 0x16f   :  { %v334_v0 = vmul.f32 800.0, %v184_v62 }
 0x171   :  { %v350_v2 = vadd.f32 %v403_v63, %v334_v0 }
 0x173   :  { %366 = vst [vmem:[%s581_s1 + $0x40] sm:$0xff] %v350_v2 }
 0x176   :  { %v187_v3 = vpop.f32.mrf.mxu2 }
 0x177   :  { %v335_v5 = vmul.f32 800.0, %v187_v3 }
 0x179   :  { %v351_v7 = vadd.f32 %v404_v4, %v335_v5 }
 0x17b   :  { %367 = vst [vmem:[%s581_s1 + $0x48] sm:$0xff] %v351_v7 }
 0x17e   :  { %v190_v8 = vpop.f32.mrf.mxu2 }
 0x17f   :  { %v336_v10 = vmul.f32 800.0, %v190_v8 }
 0x181   :  { %v352_v12 = vadd.f32 %v405_v9, %v336_v10 }
 0x183   :  { %368 = vst [vmem:[%s581_s1 + $0x50] sm:$0xff] %v352_v12 }
 0x186   :  { %v193_v13 = vpop.f32.mrf.mxu2 }
 0x187   :  { %v337_v15 = vmul.f32 800.0, %v193_v13 }
 0x189   :  { %v353_v17 = vadd.f32 %v406_v14, %v337_v15 }
 0x18b   :  { %369 = vst [vmem:[%s581_s1 + $0x58] sm:$0xff] %v353_v17 }
 0x18e   :  { %v196_v20 = vpop.f32.mrf.mxu3 }
 0x18f   :  { %v338_v23 = vmul.f32 800.0, %v196_v20 }
 0x191   :  { %v354_v25 = vadd.f32 %v407_v21, %v338_v23 }
 0x193   :  { %370 = vst [vmem:[%s581_s1 + $0x60] sm:$0xff] %v354_v25 }
 0x196   :  { %v199_v26 = vpop.f32.mrf.mxu3 }
 0x197   :  { %v339_v28 = vmul.f32 800.0, %v199_v26 }
 0x199   :  { %v355_v30 = vadd.f32 %v408_v27, %v339_v28 }
 0x19b   :  { %371 = vst [vmem:[%s581_s1 + $0x68] sm:$0xff] %v355_v30 }
 0x19e   :  { %v202_v31 = vpop.f32.mrf.mxu3 }
 0x19f   :  { %v340_v33 = vmul.f32 800.0, %v202_v31 }
 0x1a1   :  { %v356_v35 = vadd.f32 %v409_v32, %v340_v33 }
 0x1a3   :  { %372 = vst [vmem:[%s581_s1 + $0x70] sm:$0xff] %v356_v35 }
 0x1a6   :  { %v205_v36 = vpop.f32.mrf.mxu3 }
 0x1a7   :  { %v341_v38 = vmul.f32 800.0, %v205_v36 }
 0x1a9   :  { %v357_v39 = vadd.f32 %v410_v37, %v341_v38 }
 0x1ab   :  { %373 = vst [vmem:[%s581_s1 + $0x78] sm:$0xff] %v357_v39 }
 0x1ac   :  { %378 = vsyncpa [#allocation4], 1 }

</bundles_post_ra>
